<compile_context>
chip_gen: v7x
topology: tpu7x:2x2x1
jax: 0.10.0
libtpu: 0.0.40
codegen_flags: <defaults>
</compile_context>

<pallas_src>
import functools
import math

import jax
import jax.numpy as jnp
from jax.experimental import pallas as pl
from jax.experimental.pallas import tpu as pltpu

LOG_2PI = math.log(2.0 * math.pi)


def _round_up(x, m):
    return (x + m - 1) // m * m


def _actor_critic_kernel(
    state_ref, action_ref, inv_var_ref, shift_ref,
    w1, w2, w3, w4, w5, b_hidden_ref, b_head_ref,
    out_ref,
    *, action_dim, bias_segments,
):
    x = state_ref[...]            # (tb, S) f32
    a = action_ref[...]           # (tb, A) f32
    inv_var = inv_var_ref[...]    # (1, A)  f32
    shift = shift_ref[0, 0]       # f32 SMEM scalar: -0.5*(k*log(2*pi)+log|Sigma|)

    def mm(h_bf16, w_ref):
        # bf16 MXU matmul, f32 accumulation (weights pre-cast to bf16).
        return jnp.dot(h_bf16, w_ref[...], preferred_element_type=jnp.float32)

    # ---- fused [actor|critic] hidden chain, bf16 activations ----
    h = x.astype(jnp.bfloat16)
    for w_ref, (off, seg, width) in zip((w1, w2, w3, w4), bias_segments):
        b = b_hidden_ref[:, off:off + seg]        # 128-aligned packed segment (bf16)
        if width < seg:
            b = b[:, :width]
        h = jnp.maximum(mm(h, w_ref).astype(jnp.bfloat16) + b, 0.0)

    # ---- fused head: cols [0, A) = action_mean (ReLU, as in the module),
    #      col A = state value (no activation). f32 for the log-prob math.
    head = mm(h, w5) + b_head_ref[...]            # (tb, A+1) f32
    action_mean = jnp.maximum(head[:, :action_dim], 0.0)
    value = head[:, action_dim:action_dim + 1]    # (tb, 1)

    # ---- diagonal-covariance MultivariateNormal log_prob (f32) ----
    diff = a - action_mean
    maha = jnp.sum(diff * diff * inv_var, axis=-1, keepdims=True)   # (tb, 1)
    logp = -0.5 * maha + shift                                      # (tb, 1)

    # Lane-dense output: one (2, tb) full-block store (row 0 = logp, row 1 = value).
    out_ref[...] = jnp.transpose(jnp.concatenate([logp, value], axis=-1))


def actor_critic_evaluate(state, action, action_var, params, *, tb=512):
    """Pallas equivalent of ActorCritic.evaluate(state, action).

    Returns (action_logprobs [B], state_values [B, 1], dist_entropy [B]).
    `tb` is the batch tile (rounded to a multiple of 128); default 512.
    """
    B, S = state.shape
    A = action.shape[1]
    assert action.shape[0] == B

    # ---- batch tiling: 128-lane multiples for the (2, tb) output blocks, and
    #      >= 2 grid steps whenever the batch spans more than one tile (v7x).
    tb_eff = max(128, min(_round_up(tb, 128), _round_up(B, 128)))
    if _round_up(B, 128) >= 256:
        tb_eff = min(tb_eff, _round_up(-(-B // 2), 128))
    Bp = _round_up(B, tb_eff)
    if Bp != B:
        pad = Bp - B
        state = jnp.pad(state, ((0, pad), (0, 0)))
        action = jnp.pad(action, ((0, pad), (0, 0)))

    (aw, ab), (cw, cb) = params["actor"], params["critic"]

    def block_diag(wa, wc):
        za = jnp.zeros((wa.shape[0], wc.shape[1]), wa.dtype)
        zc = jnp.zeros((wc.shape[0], wa.shape[1]), wc.dtype)
        return jnp.concatenate(
            [jnp.concatenate([wa, za], axis=1),
             jnp.concatenate([zc, wc], axis=1)], axis=0)

    # Layer 1: both branches read the same state -> plain column concat.
    ws = [jnp.concatenate([aw[0], cw[0]], axis=1)]
    bs = [jnp.concatenate([ab[0], cb[0]])]
    # Layers 2-5: block-diagonal fusion over the concatenated [actor|critic] slab.
    for wa, ba, wc, bc in zip(aw[1:], ab[1:], cw[1:], cb[1:]):
        ws.append(block_diag(wa, wc))
        bs.append(jnp.concatenate([ba, bc]))
    assert len(ws) == 5

    weights = [w.astype(jnp.bfloat16) for w in ws]

    # Packed bf16 hidden biases; each segment padded to a 128-lane boundary so
    # the kernel only slices the ref at aligned offsets.
    hidden_widths = tuple(int(b.shape[0]) for b in bs[:-1])          # (512,256,128,64)
    seg_sizes = tuple(_round_up(w, 128) for w in hidden_widths)
    bias_segments, off = [], 0
    packed_bias = jnp.zeros((1, sum(seg_sizes)), jnp.bfloat16)
    for b, seg, width in zip(bs[:-1], seg_sizes, hidden_widths):
        packed_bias = packed_bias.at[0, off:off + width].set(b.astype(jnp.bfloat16))
        bias_segments.append((off, seg, width))
        off += seg
    bias_segments = tuple(bias_segments)
    head_b = bs[-1].reshape(1, -1).astype(jnp.float32)               # (1, A+1)

    # Distribution constants hoisted out of the kernel (no log / div / XLU sum per step).
    action_var = action_var.astype(jnp.float32)
    inv_var = (1.0 / action_var).reshape(1, A)
    log_det = jnp.sum(jnp.log(action_var))
    shift = (-0.5 * (A * LOG_2PI + log_det)).reshape(1, 1).astype(jnp.float32)
    entropy = (0.5 * A * (1.0 + LOG_2PI) + 0.5 * log_det).astype(jnp.float32)

    full = lambda arr: pl.BlockSpec(arr.shape, lambda i: (0, 0))
    in_specs = [
        pl.BlockSpec((tb_eff, S), lambda i: (i, 0)),                 # state
        pl.BlockSpec((tb_eff, A), lambda i: (i, 0)),                 # action
        full(inv_var),                                               # 1 / var
        pl.BlockSpec(memory_space=pltpu.MemorySpace.SMEM),           # logp shift scalar
    ] + [full(w) for w in weights] + [full(packed_bias), full(head_b)]

    out = pl.pallas_call(
        functools.partial(_actor_critic_kernel,
                          action_dim=A, bias_segments=bias_segments),
        out_shape=jax.ShapeDtypeStruct((2, Bp), jnp.float32),
        grid_spec=pltpu.PrefetchScalarGridSpec(
            num_scalar_prefetch=0,
            grid=(Bp // tb_eff,),
            in_specs=in_specs,
            out_specs=pl.BlockSpec((2, tb_eff), lambda i: (0, i)),
        ),
        compiler_params=pltpu.CompilerParams(
            dimension_semantics=("parallel",),
            vmem_limit_bytes=32 * 1024 * 1024),
    )(state, action, inv_var, shift, *weights, packed_bias, head_b)

    logp = out[0, :B]
    value = out[1, :B].reshape(B, 1)
    dist_entropy = jnp.broadcast_to(entropy, (B,))
    return logp, value, dist_entropy


def init_params(key, state_dim, action_dim):
    """Deterministic synthetic init (stands in for initialize_weights)."""
    actor_dims = [state_dim, 256, 128, 64, 32, action_dim]
    critic_dims = [state_dim, 256, 128, 64, 32, 1]

    def make_mlp(key, dims):
        ws, bs = [], []
        for din, dout in zip(dims[:-1], dims[1:]):
            key, kw, kb = jax.random.split(key, 3)
            scale = 1.0 / math.sqrt(din)
            ws.append(jax.random.uniform(kw, (din, dout), jnp.float32, -scale, scale))
            bs.append(jax.random.uniform(kb, (dout,), jnp.float32, -scale, scale))
        return key, (tuple(ws), tuple(bs))

    key, actor = make_mlp(key, actor_dims)
    key, critic = make_mlp(key, critic_dims)
    return {"actor": actor, "critic": critic}


def _reference_evaluate(state, action, action_var, params):
    """Plain-JAX reference mirroring the module (same bf16-matmul / f32 recipe)."""
    (aw, ab), (cw, cb) = params["actor"], params["critic"]

    def mm(h, w):
        return jnp.dot(h.astype(jnp.bfloat16), w.astype(jnp.bfloat16),
                       preferred_element_type=jnp.float32)

    def hidden(h, w, b):
        return jnp.maximum(mm(h, w).astype(jnp.bfloat16) + b.astype(jnp.bfloat16), 0.0)

    h = state
    for w, b in zip(aw[:-1], ab[:-1]):
        h = hidden(h, w, b)
    mean = jnp.maximum(mm(h, aw[-1]) + ab[-1], 0.0)      # module applies ReLU on the mean head

    g = state
    for w, b in zip(cw[:-1], cb[:-1]):
        g = hidden(g, w, b)
    value = mm(g, cw[-1]) + cb[-1]

    k = action.shape[1]
    av = action_var.astype(jnp.float32)
    log_det = jnp.sum(jnp.log(av))
    diff = action - mean
    maha = jnp.sum(diff * diff / av[None, :], axis=-1)
    logp = -0.5 * maha - 0.5 * (k * LOG_2PI + log_det)
    ent = jnp.full((state.shape[0],), 0.5 * k * (1.0 + LOG_2PI) + 0.5 * log_det)
    return logp, value, ent


if __name__ == "__main__":
    STATE_DIM, ACTION_DIM, ACTION_STD = 32, 4, 0.5
    BATCH = 200   # pads to 256 -> two lane-dense (2, 128) output blocks / 2 grid steps

    key = jax.random.PRNGKey(0)
    key, k_state, k_action = jax.random.split(key, 3)

    params = init_params(key, STATE_DIM, ACTION_DIM)
    state = jax.random.normal(k_state, (BATCH, STATE_DIM), jnp.float32)
    action = jax.random.normal(k_action, (BATCH, ACTION_DIM), jnp.float32)
    action_var = jnp.full((ACTION_DIM,), ACTION_STD * ACTION_STD, jnp.float32)

    logp, value, entropy = jax.jit(
        functools.partial(actor_critic_evaluate, params=params)
    )(state, action, action_var)
    jax.block_until_ready((logp, value, entropy))

    ref_logp, ref_value, ref_ent = _reference_evaluate(state, action, action_var, params)
    assert logp.shape == (BATCH,) and value.shape == (BATCH, 1) and entropy.shape == (BATCH,)
    assert jnp.allclose(logp, ref_logp, atol=2e-3, rtol=2e-3)
    assert jnp.allclose(value, ref_value, atol=2e-3, rtol=2e-3)
    assert jnp.allclose(entropy, ref_ent, atol=1e-4, rtol=1e-4)

    print("KERNEL_OK")
</pallas_src>

<mosaic_0001>
module attributes {stable_mosaic.version = 11 : i64} {
  func.func @_actor_critic_kernel(%arg0: i32, %arg1: memref<128x32xf32, #tpu.memory_space<vmem>>, %arg2: memref<128x4xf32, #tpu.memory_space<vmem>>, %arg3: memref<1x4xf32, #tpu.memory_space<vmem>>, %arg4: memref<1x1xf32, #tpu.memory_space<smem>>, %arg5: memref<32x512xbf16, #tpu.memory_space<vmem>>, %arg6: memref<512x256xbf16, #tpu.memory_space<vmem>>, %arg7: memref<256x128xbf16, #tpu.memory_space<vmem>>, %arg8: memref<128x64xbf16, #tpu.memory_space<vmem>>, %arg9: memref<64x5xbf16, #tpu.memory_space<vmem>>, %arg10: memref<1x1024xbf16, #tpu.memory_space<vmem>>, %arg11: memref<1x5xf32, #tpu.memory_space<vmem>>, %arg12: memref<2x128xf32, #tpu.memory_space<vmem>>) attributes {dimension_semantics = [#tpu.dimension_semantics<parallel>], iteration_bounds = array<i64: 2>, scalar_prefetch = 0 : i64, scratch_operands = 0 : i64, tpu.core_type = #tpu.core_type<tc>, window_params = [{transform_indices = @transform_0, window_bounds = array<i64: 128, 32>}, {transform_indices = @transform_1, window_bounds = array<i64: 128, 4>}, {pipeline_mode = #tpu.pipeline_mode<synchronous>, transform_indices = @transform_2, window_bounds = array<i64: 1, 4>}, {transform_indices = @transform_3, window_bounds = array<i64: 1, 1>}, {pipeline_mode = #tpu.pipeline_mode<synchronous>, transform_indices = @transform_4, window_bounds = array<i64: 32, 512>}, {pipeline_mode = #tpu.pipeline_mode<synchronous>, transform_indices = @transform_5, window_bounds = array<i64: 512, 256>}, {pipeline_mode = #tpu.pipeline_mode<synchronous>, transform_indices = @transform_6, window_bounds = array<i64: 256, 128>}, {pipeline_mode = #tpu.pipeline_mode<synchronous>, transform_indices = @transform_7, window_bounds = array<i64: 128, 64>}, {pipeline_mode = #tpu.pipeline_mode<synchronous>, transform_indices = @transform_8, window_bounds = array<i64: 64, 5>}, {pipeline_mode = #tpu.pipeline_mode<synchronous>, transform_indices = @transform_9, window_bounds = array<i64: 1, 1024>}, {pipeline_mode = #tpu.pipeline_mode<synchronous>, transform_indices = @transform_10, window_bounds = array<i64: 1, 5>}, {transform_indices = @transform_11, window_bounds = array<i64: 2, 128>}]} {
    %c0 = arith.constant 0 : index
    %c0_0 = arith.constant 0 : index
    %0 = vector.load %arg1[%c0, %c0_0] : memref<128x32xf32, #tpu.memory_space<vmem>>, vector<128x32xf32>
    %c0_1 = arith.constant 0 : index
    %c0_2 = arith.constant 0 : index
    %1 = vector.load %arg2[%c0_1, %c0_2] : memref<128x4xf32, #tpu.memory_space<vmem>>, vector<128x4xf32>
    %c0_3 = arith.constant 0 : index
    %c0_4 = arith.constant 0 : index
    %2 = vector.load %arg3[%c0_3, %c0_4] : memref<1x4xf32, #tpu.memory_space<vmem>>, vector<1x4xf32>
    %c0_5 = arith.constant 0 : index
    %c0_6 = arith.constant 0 : index
    %3 = memref.load %arg4[%c0_5, %c0_6] : memref<1x1xf32, #tpu.memory_space<smem>>
    %4 = arith.truncf %0 : vector<128x32xf32> to vector<128x32xbf16>
    %c0_7 = arith.constant 0 : index
    %c0_8 = arith.constant 0 : index
    %5 = vector.load %arg10[%c0_7, %c0_8] : memref<1x1024xbf16, #tpu.memory_space<vmem>>, vector<1x512xbf16>
    %c0_9 = arith.constant 0 : index
    %c0_10 = arith.constant 0 : index
    %6 = vector.load %arg5[%c0_9, %c0_10] : memref<32x512xbf16, #tpu.memory_space<vmem>>, vector<32x512xbf16>
    %cst = arith.constant dense<0.000000e+00> : vector<128x512xf32>
    %7 = tpu.matmul %4, %6, %cst {dimension_numbers = #tpu.dot_dimension_numbers<[1], [0], [0], [1], [0, 0, 1, 1], [], []>} : vector<128x32xbf16>, vector<32x512xbf16>, vector<128x512xf32> -> vector<128x512xf32>
    %8 = arith.truncf %7 : vector<128x512xf32> to vector<128x512xbf16>
    %9 = vector.broadcast %5 : vector<1x512xbf16> to vector<128x512xbf16>
    %10 = arith.addf %8, %9 : vector<128x512xbf16>
    %cst_11 = arith.constant 0.000000e+00 : bf16
    %11 = vector.broadcast %cst_11 : bf16 to vector<128x512xbf16>
    %12 = arith.maximumf %10, %11 : vector<128x512xbf16>
    %c0_12 = arith.constant 0 : index
    %c512 = arith.constant 512 : index
    %13 = vector.load %arg10[%c0_12, %c512] : memref<1x1024xbf16, #tpu.memory_space<vmem>>, vector<1x256xbf16>
    %c0_13 = arith.constant 0 : index
    %c0_14 = arith.constant 0 : index
    %14 = vector.load %arg6[%c0_13, %c0_14] : memref<512x256xbf16, #tpu.memory_space<vmem>>, vector<512x256xbf16>
    %cst_15 = arith.constant dense<0.000000e+00> : vector<128x256xf32>
    %15 = tpu.matmul %12, %14, %cst_15 {dimension_numbers = #tpu.dot_dimension_numbers<[1], [0], [0], [1], [0, 0, 1, 1], [], []>} : vector<128x512xbf16>, vector<512x256xbf16>, vector<128x256xf32> -> vector<128x256xf32>
    %16 = arith.truncf %15 : vector<128x256xf32> to vector<128x256xbf16>
    %17 = vector.broadcast %13 : vector<1x256xbf16> to vector<128x256xbf16>
    %18 = arith.addf %16, %17 : vector<128x256xbf16>
    %cst_16 = arith.constant 0.000000e+00 : bf16
    %19 = vector.broadcast %cst_16 : bf16 to vector<128x256xbf16>
    %20 = arith.maximumf %18, %19 : vector<128x256xbf16>
    %c0_17 = arith.constant 0 : index
    %c768 = arith.constant 768 : index
    %21 = vector.load %arg10[%c0_17, %c768] : memref<1x1024xbf16, #tpu.memory_space<vmem>>, vector<1x128xbf16>
    %c0_18 = arith.constant 0 : index
    %c0_19 = arith.constant 0 : index
    %22 = vector.load %arg7[%c0_18, %c0_19] : memref<256x128xbf16, #tpu.memory_space<vmem>>, vector<256x128xbf16>
    %cst_20 = arith.constant dense<0.000000e+00> : vector<128x128xf32>
    %23 = tpu.matmul %20, %22, %cst_20 {dimension_numbers = #tpu.dot_dimension_numbers<[1], [0], [0], [1], [0, 0, 1, 1], [], []>} : vector<128x256xbf16>, vector<256x128xbf16>, vector<128x128xf32> -> vector<128x128xf32>
    %24 = arith.truncf %23 : vector<128x128xf32> to vector<128x128xbf16>
    %25 = vector.broadcast %21 : vector<1x128xbf16> to vector<128x128xbf16>
    %26 = arith.addf %24, %25 : vector<128x128xbf16>
    %cst_21 = arith.constant 0.000000e+00 : bf16
    %27 = vector.broadcast %cst_21 : bf16 to vector<128x128xbf16>
    %28 = arith.maximumf %26, %27 : vector<128x128xbf16>
    %c0_22 = arith.constant 0 : index
    %c896 = arith.constant 896 : index
    %29 = vector.load %arg10[%c0_22, %c896] : memref<1x1024xbf16, #tpu.memory_space<vmem>>, vector<1x128xbf16>
    %30 = vector.extract_strided_slice %29 {offsets = [0, 0], sizes = [1, 64], strides = [1, 1]} : vector<1x128xbf16> to vector<1x64xbf16>
    %c0_23 = arith.constant 0 : index
    %c0_24 = arith.constant 0 : index
    %31 = vector.load %arg8[%c0_23, %c0_24] : memref<128x64xbf16, #tpu.memory_space<vmem>>, vector<128x64xbf16>
    %cst_25 = arith.constant dense<0.000000e+00> : vector<128x64xf32>
    %32 = tpu.matmul %28, %31, %cst_25 {dimension_numbers = #tpu.dot_dimension_numbers<[1], [0], [0], [1], [0, 0, 1, 1], [], []>} : vector<128x128xbf16>, vector<128x64xbf16>, vector<128x64xf32> -> vector<128x64xf32>
    %33 = arith.truncf %32 : vector<128x64xf32> to vector<128x64xbf16>
    %34 = vector.broadcast %30 : vector<1x64xbf16> to vector<128x64xbf16>
    %35 = arith.addf %33, %34 : vector<128x64xbf16>
    %cst_26 = arith.constant 0.000000e+00 : bf16
    %36 = vector.broadcast %cst_26 : bf16 to vector<128x64xbf16>
    %37 = arith.maximumf %35, %36 : vector<128x64xbf16>
    %c0_27 = arith.constant 0 : index
    %c0_28 = arith.constant 0 : index
    %38 = vector.load %arg9[%c0_27, %c0_28] : memref<64x5xbf16, #tpu.memory_space<vmem>>, vector<64x5xbf16>
    %cst_29 = arith.constant dense<0.000000e+00> : vector<128x5xf32>
    %39 = tpu.matmul %37, %38, %cst_29 {dimension_numbers = #tpu.dot_dimension_numbers<[1], [0], [0], [1], [0, 0, 1, 1], [], []>} : vector<128x64xbf16>, vector<64x5xbf16>, vector<128x5xf32> -> vector<128x5xf32>
    %c0_30 = arith.constant 0 : index
    %c0_31 = arith.constant 0 : index
    %40 = vector.load %arg11[%c0_30, %c0_31] : memref<1x5xf32, #tpu.memory_space<vmem>>, vector<1x5xf32>
    %41 = vector.broadcast %40 : vector<1x5xf32> to vector<128x5xf32>
    %42 = arith.addf %39, %41 : vector<128x5xf32>
    %43 = vector.extract_strided_slice %42 {offsets = [0, 0], sizes = [128, 4], strides = [1, 1]} : vector<128x5xf32> to vector<128x4xf32>
    %cst_32 = arith.constant 0.000000e+00 : f32
    %44 = vector.broadcast %cst_32 : f32 to vector<128x4xf32>
    %45 = arith.maximumf %43, %44 : vector<128x4xf32>
    %46 = vector.extract_strided_slice %42 {offsets = [0, 4], sizes = [128, 1], strides = [1, 1]} : vector<128x5xf32> to vector<128x1xf32>
    %47 = arith.subf %1, %45 : vector<128x4xf32>
    %48 = arith.mulf %47, %47 : vector<128x4xf32>
    %49 = vector.broadcast %2 : vector<1x4xf32> to vector<128x4xf32>
    %50 = arith.mulf %48, %49 : vector<128x4xf32>
    %cst_33 = arith.constant dense<0.000000e+00> : vector<128xf32>
    %51 = vector.multi_reduction <add>, %50, %cst_33 [1] : vector<128x4xf32> to vector<128xf32>
    %52 = vector.shape_cast %51 : vector<128xf32> to vector<128x1xf32>
    %cst_34 = arith.constant -5.000000e-01 : f32
    %53 = vector.broadcast %cst_34 : f32 to vector<128x1xf32>
    %54 = arith.mulf %53, %52 : vector<128x1xf32>
    %55 = vector.broadcast %3 : f32 to vector<128x1xf32>
    %56 = arith.addf %54, %55 : vector<128x1xf32>
    %57 = tpu.concatenate %56, %46 in 1 : vector<128x1xf32>, vector<128x1xf32> -> vector<128x2xf32>
    %58 = tpu.transpose %57, [1, 0] : vector<128x2xf32> -> vector<2x128xf32>
    %c0_35 = arith.constant 0 : index
    %c0_36 = arith.constant 0 : index
    %59 = vector.load %arg12[%c0_35, %c0_36] : memref<2x128xf32, #tpu.memory_space<vmem>>, vector<2x128xf32>
    tpu.vector_store %arg12[%c0_35, %c0_36], %58 {strides = array<i32>} : memref<2x128xf32, #tpu.memory_space<vmem>>, vector<2x128xf32>,
    return
  }
  func.func @transform_0(%arg0: i32) -> (i32, i32) {
    %c0_i32 = arith.constant 0 : i32
    %c0_i32_0 = arith.constant 0 : i32
    return %arg0, %c0_i32 : i32, i32
  }
  func.func @transform_1(%arg0: i32) -> (i32, i32) {
    %c0_i32 = arith.constant 0 : i32
    %c0_i32_0 = arith.constant 0 : i32
    return %arg0, %c0_i32 : i32, i32
  }
  func.func @transform_2(%arg0: i32) -> (i32, i32) {
    %c0_i32 = arith.constant 0 : i32
    %c0_i32_0 = arith.constant 0 : i32
    %c0_i32_1 = arith.constant 0 : i32
    return %c0_i32, %c0_i32_0 : i32, i32
  }
  func.func @transform_3(%arg0: i32) -> (i32, i32) {
    %c0_i32 = arith.constant 0 : i32
    %c0_i32_0 = arith.constant 0 : i32
    %c0_i32_1 = arith.constant 0 : i32
    return %c0_i32, %c0_i32_0 : i32, i32
  }
  func.func @transform_4(%arg0: i32) -> (i32, i32) {
    %c0_i32 = arith.constant 0 : i32
    %c0_i32_0 = arith.constant 0 : i32
    %c0_i32_1 = arith.constant 0 : i32
    return %c0_i32, %c0_i32_0 : i32, i32
  }
  func.func @transform_5(%arg0: i32) -> (i32, i32) {
    %c0_i32 = arith.constant 0 : i32
    %c0_i32_0 = arith.constant 0 : i32
    %c0_i32_1 = arith.constant 0 : i32
    return %c0_i32, %c0_i32_0 : i32, i32
  }
  func.func @transform_6(%arg0: i32) -> (i32, i32) {
    %c0_i32 = arith.constant 0 : i32
    %c0_i32_0 = arith.constant 0 : i32
    %c0_i32_1 = arith.constant 0 : i32
    return %c0_i32, %c0_i32_0 : i32, i32
  }
  func.func @transform_7(%arg0: i32) -> (i32, i32) {
    %c0_i32 = arith.constant 0 : i32
    %c0_i32_0 = arith.constant 0 : i32
    %c0_i32_1 = arith.constant 0 : i32
    return %c0_i32, %c0_i32_0 : i32, i32
  }
  func.func @transform_8(%arg0: i32) -> (i32, i32) {
    %c0_i32 = arith.constant 0 : i32
    %c0_i32_0 = arith.constant 0 : i32
    %c0_i32_1 = arith.constant 0 : i32
    return %c0_i32, %c0_i32_0 : i32, i32
  }
  func.func @transform_9(%arg0: i32) -> (i32, i32) {
    %c0_i32 = arith.constant 0 : i32
    %c0_i32_0 = arith.constant 0 : i32
    %c0_i32_1 = arith.constant 0 : i32
    return %c0_i32, %c0_i32_0 : i32, i32
  }
  func.func @transform_10(%arg0: i32) -> (i32, i32) {
    %c0_i32 = arith.constant 0 : i32
    %c0_i32_0 = arith.constant 0 : i32
    %c0_i32_1 = arith.constant 0 : i32
    return %c0_i32, %c0_i32_0 : i32, i32
  }
  func.func @transform_11(%arg0: i32) -> (i32, i32) {
    %c0_i32 = arith.constant 0 : i32
    %c0_i32_0 = arith.constant 0 : i32
    return %c0_i32, %arg0 : i32, i32
  }
}

</mosaic_0001>

<bundles_post_ra>
// kernel: actor_critic_evaluate.1
= control target key start
LH: loop header
LB: loop body
LE: loop exit
PB: predicated region body
PF: predicated region fallthrough
CT: control target
= control target key end

     0   :  { %s3081_s19 = smov 0   ;;  %s3941_s0 = inlined_call_operand.vmem [shape: f32[256,32], index: 0, kind: input, shape index: {}]   ;;  %s3942_s1 = inlined_call_operand.vmem [shape: f32[256,4], index: 1, kind: input, shape index: {}]   ;;  %s3943_s2 = inlined_call_operand.vmem [shape: f32[1,4], index: 2, kind: input, shape index: {}]   ;;  %s3944_s3 = inlined_call_operand.<no memory space> [shape: f32[1,1], index: 3, kind: input, shape index: {}]   ;;  %s3945_s4 = inlined_call_operand.vmem [shape: bf16[32,512], index: 4, kind: input, shape index: {}]   ;;  %s3946_s5 = inlined_call_operand.vmem [shape: bf16[512,256], index: 5, kind: input, shape index: {}]   ;;  %s3947_s6 = inlined_call_operand.vmem [shape: bf16[256,128], index: 6, kind: input, shape index: {}]   ;;  %s3948_s7 = inlined_call_operand.vmem [shape: bf16[128,64], index: 7, kind: input, shape index: {}]   ;;  %s3949_s8 = inlined_call_operand.vmem [shape: bf16[64,5], index: 8, kind: input, shape index: {}]   ;;  %s3950_s9 = inlined_call_operand.vmem [shape: bf16[1,1024], index: 9, kind: input, shape index: {}]   ;;  %s3951_s10 = inlined_call_operand.vmem [shape: f32[1,5], index: 10, kind: input, shape index: {}]   ;;  %s3952_s11 = inlined_call_operand.vmem [shape: f32[2,256], index: 11, kind: output, shape index: {}]  }
   0x1   :  { %16 = sst [smem:[#allocation2]] %s3944_s3 }
   0x2 LB: > { %s3087_s20 = sadd.s32 4294967295, %s3013_s19   ;;  %p2544_p0 = scmp.ge.s32.totalorder %s3013_s19, 1  ;;  %s3013_s19 = sphi %s3081_s19, %s22_s19  }
   0x3   : > { %p350_p1 = scmp.lt.s32.totalorder %s3013_s19, 3 }
   0x5   : > { %p351_p2 = pnand %p2544_p0, %p350_p1 }
   0x6   : > { %v2871_v0 = vld [vmem:[%s3945_s4 + $0x4] ss:$16 sps:$4 sm:$0xff] (!%p351_p2)   ;;  %s2545_s3 = sshll.u32 (!%p351_p2), %s3087_s20, 4  ;;  %v2873_v1 = vld [vmem:[%s3945_s4] ss:$16 sps:$4 sm:$0xff] (!%p351_p2)   ;;  %v3015_v2 = vmov (!%p351_p2), 0  }
   0x7   : > { %354 = sbr.rel (%p351_p2) target bundleno = 1650 (0x672), region = 64  ;;  %559 = vmatprep.mubr.bf16.mxu0 (!%p351_p2), %v3015_v2  ;;  %p395_p3 = scmp.lt.s32.totalorder (!%p351_p2), %s2545_s3, 31  ;;  %672 = vmatprep.mubr.bf16.mxu1 (!%p351_p2), %v3015_v2  ;;  %v2874_v3 = vld [vmem:[%s3945_s4 + $0x24] ss:$16 sps:$4 sm:$0xff] (!%p351_p2)   ;;  %v2876_v4 = vld [vmem:[%s3945_s4 + $0x20] ss:$16 sps:$4 sm:$0xff] (!%p351_p2)  }
   0x8   : > { %527 = vmatprep.subr.bf16.mxu0 (!%p351_p2), %v2871_v0  ;;  %v2877_v5 = vld [vmem:[%s3945_s4 + $0xc] ss:$16 sps:$4 sm:$0xff] (!%p351_p2)   ;;  %v2879_v6 = vld [vmem:[%s3945_s4 + $0x8] ss:$16 sps:$4 sm:$0xff] (!%p351_p2)   ;;  %vm502_vm0 = vcmask (!%p351_p2), 261120   ;;  %vm2087_vm1 = vcmask (!%p351_p2), 523264  }
   0x9   : > { %528 = vmatpush1.bf16.msra.mxu0 (!%p351_p2), %v2873_v1  ;;  %v2880_v7 = vld [vmem:[%s3945_s4 + $0x2c] ss:$16 sps:$4 sm:$0xff] (!%p351_p2)   ;;  %640 = vmatprep.subr.bf16.mxu1 (!%p351_p2), %v2877_v5  ;;  %v2882_v8 = vld [vmem:[%s3945_s4 + $0x28] ss:$16 sps:$4 sm:$0xff] (!%p351_p2)   ;;  %v797_v5 = vlaneseq (!%p351_p2)  ;;  %s3017_s29 = smov (!%p351_p2), 125   ;;  %vm2279_vm2 = vcmask (!%p351_p2), 31744  }
   0xa   : > { %529 = vmatprep.subr.bf16.mxu0 (!%p351_p2), %v2874_v3  ;;  %641 = vmatpush1.bf16.msra.mxu1 (!%p351_p2), %v2879_v6  ;;  %v2885_v9 = vld [vmem:[%s3946_s5 + $0x4] ss:$8 sps:$4 sm:$0xff] (!%p351_p2)   ;;  %v2883_v12 = vld [vmem:[%s3946_s5] ss:$8 sps:$4 sm:$0xff] (!%p351_p2)   ;;  %v2886_v16 = vld [vmem:[%s3946_s5 + $0x10] ss:$8 sps:$4 sm:$0xff] (!%p351_p2)  }
   0xb   : > { %642 = vmatprep.subr.bf16.mxu1 (!%p351_p2), %v2880_v7  ;;  %v2888_v17 = vld [vmem:[%s3946_s5 + $0x14] ss:$8 sps:$4 sm:$0xff] (!%p351_p2)   ;;  %v2891_v19 = vld [vmem:[%s3946_s5 + $0x24] ss:$8 sps:$4 sm:$0xff] (!%p351_p2)   ;;  %v2889_v20 = vld [vmem:[%s3946_s5 + $0x20] ss:$8 sps:$4 sm:$0xff] (!%p351_p2)  }
   0xc   : > { %v2894_v21 = vld [vmem:[%s3946_s5 + $0x34] ss:$8 sps:$4 sm:$0xff] (!%p351_p2)   ;;  %v2892_v24 = vld [vmem:[%s3946_s5 + $0x30] ss:$8 sps:$4 sm:$0xff] (!%p351_p2)   ;;  %v2897_v25 = vld [vmem:[%s3946_s5 + $0x44] ss:$8 sps:$4 sm:$0xff] (!%p351_p2)  }
   0xd   : > { %530 = vmatpush1.bf16.msra.mxu0 (!%p351_p2), %v2876_v4  ;;  %v2895_v27 = vld [vmem:[%s3946_s5 + $0x40] ss:$8 sps:$4 sm:$0xff] (!%p351_p2)   ;;  %v2900_v28 = vld [vmem:[%s3946_s5 + $0x54] ss:$8 sps:$4 sm:$0xff] (!%p351_p2)   ;;  %v2898_v31 = vld [vmem:[%s3946_s5 + $0x50] ss:$8 sps:$4 sm:$0xff] (!%p351_p2)  }
   0xe   : > { %s3954_s3 = smov (!%p395_p3, %s2545_s3), 31  ;;  %1287 = vmatprep.subr.bf16.mxu0 %v2885_v9  ;;  %643 = vmatpush1.bf16.msra.mxu1 %v2882_v8  ;;  %v2903_v32 = vld [vmem:[%s3946_s5 + $0x64] ss:$8 sps:$4 sm:$0xff]   ;;  %v2901_v34 = vld [vmem:[%s3946_s5 + $0x60] ss:$8 sps:$4 sm:$0xff]   ;;  %v798_v7 = vshrl.u32 %v797_v5, 7 }
   0xf   : > { %s2546_s16 = sshll.u32 %s3954_s3, 3  ;;  %v2906_v35 = vld [vmem:[%s3946_s5 + $0x74] ss:$8 sps:$4 sm:$0xff]   ;;  %v2904_v38 = vld [vmem:[%s3946_s5 + $0x70] ss:$8 sps:$4 sm:$0xff]   ;;  %v2988_v5 = vld [vmem:[%s3947_s6 + $0x20] sm:$0xff]  }
  0x10   : > { %s3123_s21 = scalar_lea.vmem %s3941_s0, %s2546_s16  ;;  %v2909_v39 = vld [vmem:[%s3946_s5 + $0x84] ss:$8 sps:$4 sm:$0xff]   ;;  %v2907_v41 = vld [vmem:[%s3946_s5 + $0x80] ss:$8 sps:$4 sm:$0xff]   ;;  %v2912_v42 = vld [vmem:[%s3946_s5 + $0x94] ss:$8 sps:$4 sm:$0xff]   ;;  %s3775_s13 = scalar_lea.vmem %s3942_s1, %s2546_s16 }
  0x11   : > { %v411_v10 = vld [vmem:[%s3123_s21] sm:$0xff]  ;;  %v412_v11 = vld [vmem:[%s3123_s21 + $0x8] sm:$0xff]  ;;  %v413_v14 = vld [vmem:[%s3123_s21 + $0x10] sm:$0xff]  ;;  %v3016_v3 = vmov 1966171168   ;;  %s444_s14 = sld [smem:[#allocation2]] }
  0x12   : > { %v445_v13 = vpack.c.bf16 %v412_v11, %v411_v10  ;;  %v414_v15 = vld [vmem:[%s3123_s21 + $0x18] sm:$0xff]  ;;  %v415_v22 = vld [vmem:[%s3123_s21 + $0x20] sm:$0xff]  ;;  %v416_v23 = vld [vmem:[%s3123_s21 + $0x28] sm:$0xff]  ;;  %v795_v4 = vunpack.c.l.s4 %v3016_v3  ;;  %vm2425_vm3 = vcmask 7168   ;;  %p406_p4 = scmp.lt.s32.totalorder %s3087_s20, 1 }
  0x13   : > { %v446_v18 = vpack.c.bf16 %v414_v15, %v413_v14  ;;  %v447_v26 = vpack.c.bf16 %v416_v23, %v415_v22  ;;  %v417_v29 = vld [vmem:[%s3123_s21 + $0x30] sm:$0xff]  ;;  %v418_v30 = vld [vmem:[%s3123_s21 + $0x38] sm:$0xff]  ;;  %v419_v36 = vld [vmem:[%s3123_s21 + $0x40] sm:$0xff]  ;;  %v3286_v14 = vsub.s32 0, %v798_v7 }
  0x14   : > { %2558 = vmatmul.mubr.msk.bf16.vlgmr.msra.gmra.mrb[0].mxu0 %vm502_vm0, %v445_v13  ;;  %2566 = vmatmul.mubr.msk.bf16.vlgmr.msra.gmra.mrb[0].mxu1 %vm502_vm0, %v445_v13  ;;  %v448_v33 = vpack.c.bf16 %v418_v30, %v417_v29  ;;  %v420_v37 = vld [vmem:[%s3123_s21 + $0x48] sm:$0xff]  ;;  %v421_v43 = vld [vmem:[%s3123_s21 + $0x50] sm:$0xff]  ;;  %v422_v44 = vld [vmem:[%s3123_s21 + $0x58] sm:$0xff]  ;;  %v796_v6 = vunpack.c.0.s8 %v795_v4  ;;  %s3956_s20 = smov (!%p406_p4, %s3087_s20), 1 }
  0x15   : > { %569 = vmatprep.mubr.bf16.mxu0 %v3015_v2  ;;  %1288 = vmatpush1.bf16.msra.mxu0 %v2883_v12  ;;  %v449_v40 = vpack.c.bf16 %v420_v37, %v419_v36  ;;  %v2910_v45 = vld [vmem:[%s3946_s5 + $0x90] ss:$8 sps:$4 sm:$0xff]   ;;  %v2915_v46 = vld [vmem:[%s3946_s5 + $0xa4] ss:$8 sps:$4 sm:$0xff]   ;;  %v450_v47 = vpack.c.bf16 %v422_v44, %v421_v43  ;;  %v2913_v48 = vld [vmem:[%s3946_s5 + $0xa0] ss:$8 sps:$4 sm:$0xff]  }
  0x16   : > { %682 = vmatprep.mubr.bf16.mxu1 %v3015_v2  ;;  %1289 = vmatprep.subr.bf16.mxu0 %v2888_v17  ;;  %v2918_v49 = vld [vmem:[%s3946_s5 + $0xb4] ss:$8 sps:$4 sm:$0xff]   ;;  %v423_v50 = vld [vmem:[%s3123_s21 + $0x60] sm:$0xff]  ;;  %v424_v51 = vld [vmem:[%s3123_s21 + $0x68] sm:$0xff]  ;;  %v3276_v9 = vsub.s32 %v796_v6, %v798_v7  ;;  %s2549_s15 = sshll.u32 %s3956_s20, 1 }
  0x17   : > { %v2916_v52 = vld [vmem:[%s3946_s5 + $0xb0] ss:$8 sps:$4 sm:$0xff]   ;;  %v2921_v53 = vld [vmem:[%s3946_s5 + $0xc4] ss:$8 sps:$4 sm:$0xff]   ;;  %v451_v54 = vpack.c.bf16 %v424_v51, %v423_v50  ;;  %v2919_v55 = vld [vmem:[%s3946_s5 + $0xc0] ss:$8 sps:$4 sm:$0xff]   ;;  %s409_s18 = scalar_lea.vmem %s3952_s11, %s2549_s15 }
  0x18   : > { %v2924_v56 = vld [vmem:[%s3946_s5 + $0xd4] ss:$8 sps:$4 sm:$0xff]   ;;  %v2922_v59 = vld [vmem:[%s3946_s5 + $0xd0] ss:$8 sps:$4 sm:$0xff]   ;;  %v2927_v61 = vld [vmem:[%s3946_s5 + $0xe4] ss:$8 sps:$4 sm:$0xff]  }
  0x19   : > { %1290 = vmatpush1.bf16.msra.mxu0 %v2886_v16  ;;  %v425_v57 = vld [vmem:[%s3123_s21 + $0x70] sm:$0xff]  ;;  %v426_v58 = vld [vmem:[%s3123_s21 + $0x78] sm:$0xff]  ;;  %v2925_v62 = vld [vmem:[%s3946_s5 + $0xe0] ss:$8 sps:$4 sm:$0xff]  }
  0x1a   : > { %1291 = vmatprep.subr.bf16.mxu0 %v2891_v19  ;;  %v452_v60 = vpack.c.bf16 %v426_v58, %v425_v57  ;;  %v2930_v63 = vld [vmem:[%s3946_s5 + $0xf4] ss:$8 sps:$4 sm:$0xff]   ;;  %v2928_v0 = vld [vmem:[%s3946_s5 + $0xf0] ss:$8 sps:$4 sm:$0xff]   ;;  %v2933_v1 = vld [vmem:[%s3946_s5 + $0x104] ss:$8 sps:$4 sm:$0xff]  }
  0x1b   : > { %v2574_v8 = vld.sshfl [vmem:[%s3950_s9] sm:$0x33 pattern:$0x75316420]  ;;  %v2983_v36 = vld [vmem:[%s3947_s6 + $0x50] sm:$0xff]   ;;  %v2986_v58 = vld [vmem:[%s3947_s6 + $0x18] sm:$0xff]  }
  0x1c   : > { %2559 = vmatmul.mubr.msk.bf16.gmra.mrb[4].mxu0 %vm502_vm0, %v446_v18  ;;  %2567 = vmatmul.mubr.msk.bf16.gmra.mrb[4].mxu1 %vm502_vm0, %v446_v18  ;;  %v793_v10 = vcombine.high %v2574_v8, %v2574_v8  ;;  %v3279_v11 = vrot.slane %v2574_v8, %v3276_v9  ;;  %v2984_v44 = vld [vmem:[%s3947_s6 + $0x10] sm:$0xff]  }
  0x1d   : > { %579 = vmatprep.mubr.bf16.mxu0 %v3015_v2  ;;  %1292 = vmatpush1.bf16.msra.mxu0 %v2889_v20  ;;  %v2934_v50 = vld [vmem:[%s3946_s5 + $0x110] ss:$8 sps:$4 sm:$0xff]   ;;  %v2942_v3 = vld [vmem:[%s3946_s5 + $0x134] ss:$8 sps:$4 sm:$0xff]  }
  0x1e   : > { %1293 = vmatprep.subr.bf16.mxu0 %v2894_v21  ;;  %692 = vmatprep.mubr.bf16.mxu1 %v3015_v2  ;;  %v3282_v12 = vrot.slane %v793_v10, %v3276_v9  ;;  %v811_v13 = vpack.i.b16 %v3279_v11, %v3279_v11  ;;  %v2989_v10 = vld [vmem:[%s3947_s6 + $0x68] sm:$0xff]  }
  0x20   : > { %v818_v15 = vpack.i.b16 %v3282_v12, %v3282_v12  ;;  %v3291_v18 = vrot.slane %v811_v13, %v3286_v14 }
  0x21   : > { %1294 = vmatpush1.bf16.msra.mxu0 %v2892_v24  ;;  %v2979_v24 = vld [vmem:[%s3947_s6 + $0x40] sm:$0xff]  }
  0x22   : > { %1295 = vmatprep.subr.bf16.mxu0 %v2897_v25  ;;  %v3294_v20 = vrot.slane %v818_v15, %v3286_v14  ;;  %v2980_v25 = vld [vmem:[%s3947_s6] sm:$0xff]   ;;  %2680 = vmatprep.subr.bf16.mxu1 %v2979_v24  ;;  %v2940_v15 = vld [vmem:[%s3946_s5 + $0x130] ss:$8 sps:$4 sm:$0xff]  }
  0x23   : > { %2681 = vmatpush3.bf16.msra.mxu1 %v2980_v25 }
  0x24   : > { %2560 = vmatmul.mubr.msk.bf16.gmra.mrb[8].mxu0 %vm502_vm0, %v447_v26  ;;  %2568 = vmatmul.mubr.msk.bf16.gmra.mrb[8].mxu1 %vm502_vm0, %v447_v26  ;;  %v2981_v26 = vld [vmem:[%s3947_s6 + $0x48] sm:$0xff]  }
  0x25   : > { %589 = vmatprep.mubr.bf16.mxu0 %v3015_v2  ;;  %1296 = vmatpush1.bf16.msra.mxu0 %v2895_v27 }
  0x26   : > { %1297 = vmatprep.subr.bf16.mxu0 %v2900_v28  ;;  %702 = vmatprep.mubr.bf16.mxu1 %v3015_v2 }
  0x27   : > { %2682 = vmatprep.subr.bf16.mxu1 %v2981_v26  ;;  %v2990_v26 = vld [vmem:[%s3947_s6 + $0x28] sm:$0xff]  }
  0x29   : > { %1298 = vmatpush1.bf16.msra.mxu0 %v2898_v31 }
  0x2a   : > { %1299 = vmatprep.subr.bf16.mxu0 %v2903_v32 }
  0x2c   : > { %2561 = vmatmul.mubr.msk.bf16.gmra.mrb[12].mxu0 %vm502_vm0, %v448_v33  ;;  %2569 = vmatmul.mubr.msk.bf16.gmra.mrb[12].mxu1 %vm502_vm0, %v448_v33 }
  0x2d   : > { %599 = vmatprep.mubr.bf16.mxu0 %v3015_v2  ;;  %1300 = vmatpush1.bf16.msra.mxu0 %v2901_v34  ;;  %v2982_v34 = vld [vmem:[%s3947_s6 + $0x8] sm:$0xff]  }
  0x2e   : > { %1301 = vmatprep.subr.bf16.mxu0 %v2906_v35  ;;  %712 = vmatprep.mubr.bf16.mxu1 %v3015_v2 }
  0x2f   : > { %2683 = vmatpush3.bf16.msra.mxu1 %v2982_v34 }
  0x30   : > { %2684 = vmatprep.subr.bf16.mxu1 %v2983_v36  ;;  %v2943_v36 = vld [vmem:[%s3946_s5 + $0x140] ss:$8 sps:$4 sm:$0xff]  }
  0x31   : > { %1302 = vmatpush1.bf16.msra.mxu0 %v2904_v38 }
  0x32   : > { %1303 = vmatprep.subr.bf16.mxu0 %v2909_v39  ;;  %v2931_v39 = vld [vmem:[%s3946_s5 + $0x100] ss:$8 sps:$4 sm:$0xff]  }
  0x33   : > { %2685 = vmatpush3.bf16.msra.mxu1 %v2984_v44 }
  0x34   : > { %2562 = vmatmul.mubr.msk.bf16.gmra.mrb[16].mxu0 %vm502_vm0, %v449_v40  ;;  %2570 = vmatmul.mubr.msk.bf16.gmra.mrb[16].mxu1 %vm502_vm0, %v449_v40 }
  0x35   : > { %609 = vmatprep.mubr.bf16.mxu0 %v3015_v2  ;;  %1304 = vmatpush1.bf16.msra.mxu0 %v2907_v41 }
  0x36   : > { %1305 = vmatprep.subr.bf16.mxu0 %v2912_v42  ;;  %722 = vmatprep.mubr.bf16.mxu1 %v3015_v2  ;;  %v2936_v42 = vld [vmem:[%s3946_s5 + $0x114] ss:$8 sps:$4 sm:$0xff]  }
  0x39   : > { %1306 = vmatpush1.bf16.msra.mxu0 %v2910_v45 }
  0x3a   : > { %1307 = vmatprep.subr.bf16.mxu0 %v2915_v46 }
  0x3c   : > { %2563 = vmatmul.mubr.msk.bf16.gmra.mrb[20].mxu0 %vm502_vm0, %v450_v47  ;;  %2571 = vmatmul.mubr.msk.bf16.gmra.mrb[20].mxu1 %vm502_vm0, %v450_v47 }
  0x3d   : > { %619 = vmatprep.mubr.bf16.mxu0 %v3015_v2  ;;  %1308 = vmatpush1.bf16.msra.mxu0 %v2913_v48  ;;  %v2985_v48 = vld [vmem:[%s3947_s6 + $0x58] sm:$0xff]  }
  0x3e   : > { %1309 = vmatprep.subr.bf16.mxu0 %v2918_v49  ;;  %732 = vmatprep.mubr.bf16.mxu1 %v3015_v2 }
  0x3f   : > { %2686 = vmatprep.subr.bf16.mxu1 %v2985_v48 }
  0x40   : > { %2687 = vmatpush3.bf16.msra.mxu1 %v2986_v58 }
  0x41   : > { %1310 = vmatpush1.bf16.msra.mxu0 %v2916_v52 }
  0x42   : > { %1311 = vmatprep.subr.bf16.mxu0 %v2921_v53  ;;  %v2939_v53 = vld [vmem:[%s3946_s5 + $0x124] ss:$8 sps:$4 sm:$0xff]  }
  0x44   : > { %2564 = vmatmul.mubr.msk.bf16.gmra.mrb[24].mxu0 %vm502_vm0, %v451_v54  ;;  %2572 = vmatmul.mubr.msk.bf16.gmra.mrb[24].mxu1 %vm502_vm0, %v451_v54 }
  0x45   : > { %629 = vmatprep.mubr.bf16.mxu0 %v3015_v2  ;;  %1312 = vmatpush1.bf16.msra.mxu0 %v2919_v55 }
  0x46   : > { %1313 = vmatprep.subr.bf16.mxu0 %v2924_v56  ;;  %742 = vmatprep.mubr.bf16.mxu1 %v3015_v2 }
  0x49   : > { %1314 = vmatpush1.bf16.msra.mxu0 %v2922_v59 }
  0x4a   : > { %1315 = vmatprep.subr.bf16.mxu0 %v2927_v61 }
  0x4c   : > { %2565 = vmatmul.mubr.msk.bf16.gmra.mrb[28].mxu0 %vm502_vm0, %v452_v60  ;;  %2573 = vmatmul.mubr.msk.bf16.gmra.mrb[28].mxu1 %vm502_vm0, %v452_v60  ;;  %v2987_v60 = vld [vmem:[%s3947_s6 + $0x60] sm:$0xff]  }
  0x4d   : > { %1316 = vmatpush1.bf16.msra.mxu0 %v2925_v62  ;;  %2688 = vmatprep.subr.bf16.mxu1 %v2987_v60 }
  0x4e   : > { %1317 = vmatprep.subr.bf16.mxu0 %v2930_v63  ;;  %v2937_v63 = vld [vmem:[%s3946_s5 + $0x120] ss:$8 sps:$4 sm:$0xff]   ;;  %2689 = vmatpush3.bf16.msra.mxu1 %v2988_v5 }
  0x4f   : > { %2690 = vmatprep.subr.bf16.mxu1 %v2989_v10 }
  0x51   : > { %1318 = vmatpush1.bf16.msra.mxu0 %v2928_v0 }
  0x52   : > { %1400 = vmatprep.subr.bf16.mxu0 %v2933_v1  ;;  %2691 = vmatpush3.bf16.msra.mxu1 %v2990_v26 }
  0xe7   : > { %v561_v16 = vpop.f32.mrb[0].mxu0  ;;  %v3296_v23 = vpop.f32.mrb[0].mxu1 }
  0xe8   : > { %v563_v17 = vpop.f32.mrb[1].mxu0  ;;  %v3307_v28 = vpop.f32.mrb[1].mxu1 }
  0xe9   : > { %v565_v19 = vpop.f32.mrb[2].mxu0  ;;  %v3310_v30 = vpop.f32.mrb[2].mxu1 }
  0xea   : > { %v753_v21 = vpack.c.bf16 %v565_v19, %v561_v16  ;;  %v567_v22 = vpop.f32.mrb[3].mxu0  ;;  %v755_v32 = vpack.c.bf16 %v3310_v30, %v3296_v23  ;;  %v3315_v33 = vpop.f32.mrb[3].mxu1  ;;  %v2945_v19 = vld [vmem:[%s3946_s5 + $0x144] ss:$8 sps:$4 sm:$0xff]  }
  0xeb   : > { %v754_v27 = vpack.c.bf16 %v567_v22, %v563_v17  ;;  %v756_v35 = vpack.c.bf16 %v3315_v33, %v3307_v28 }
  0xec   : > { %v838_v29 = vadd.bf16 %v3291_v18, %v753_v21 }
  0xed   : > { %v839_v31 = vadd.bf16 %v3294_v20, %v754_v27 }
  0xee   : > { %v870_v40 = vmax.bf16 %v3015_v2, %v838_v29  ;;  %v2991_v29 = vld [vmem:[%s3947_s6 + $0x70] sm:$0xff]  }
  0xef   : > { %v571_v37 = vpop.f32.mrb[4].mxu0  ;;  %v871_v38 = vmax.bf16 %v3015_v2, %v839_v31  ;;  %v3336_v47 = vpop.f32.mrb[4].mxu1  ;;  %2692 = vmatprep.subr.bf16.mxu1 %v2991_v29 }
  0xf0   : > { %v573_v41 = vpop.f32.mrb[5].mxu0  ;;  %v3344_v51 = vpop.f32.mrb[5].mxu1 }
  0xf1   : > { %v575_v43 = vpop.f32.mrb[6].mxu0  ;;  %1319 = vmatprep.mubr.bf16.mxu0 %v871_v38  ;;  %v3350_v54 = vpop.f32.mrb[6].mxu1 }
  0xf2   : > { %v757_v45 = vpack.c.bf16 %v575_v43, %v571_v37  ;;  %v577_v46 = vpop.f32.mrb[7].mxu0  ;;  %1320 = vmatmul.mubr.bf16.vlgmr.msra.gmra.mrb[32].mxu0 %v870_v40  ;;  %v759_v56 = vpack.c.bf16 %v3350_v54, %v3336_v47  ;;  %v3355_v57 = vpop.f32.mrb[7].mxu1 }
  0xf3   : > { %v758_v49 = vpack.c.bf16 %v577_v46, %v573_v41  ;;  %1401 = vmatpush1.bf16.msra.mxu0 %v2931_v39  ;;  %v760_v59 = vpack.c.bf16 %v3355_v57, %v3344_v51  ;;  %v2948_v39 = vld [vmem:[%s3946_s5 + $0x154] ss:$8 sps:$4 sm:$0xff]   ;;  %v2946_v46 = vld [vmem:[%s3946_s5 + $0x150] ss:$8 sps:$4 sm:$0xff]  }
  0xf4   : > { %v842_v52 = vadd.bf16 %v3291_v18, %v757_v45  ;;  %1402 = vmatprep.subr.bf16.mxu0 %v2936_v42  ;;  %v2992_v41 = vld [vmem:[%s3947_s6 + $0x30] sm:$0xff]  }
  0xf5   : > { %v843_v55 = vadd.bf16 %v3294_v20, %v758_v49  ;;  %2693 = vmatpush3.bf16.msra.mxu1 %v2992_v41  ;;  %v2960_v41 = vld [vmem:[%s3946_s5 + $0x194] ss:$8 sps:$4 sm:$0xff]  }
  0xf6   : > { %v874_v1 = vmax.bf16 %v3015_v2, %v842_v52 }
  0xf7   : > { %1403 = vmatpush1.bf16.msra.mxu0 %v2934_v50  ;;  %v581_v61 = vpop.f32.mrb[8].mxu0  ;;  %v875_v62 = vmax.bf16 %v3015_v2, %v843_v55  ;;  %v3376_v8 = vpop.f32.mrb[8].mxu1  ;;  %v2951_v50 = vld [vmem:[%s3946_s5 + $0x164] ss:$8 sps:$4 sm:$0xff]  }
  0xf8   : > { %v583_v0 = vpop.f32.mrb[9].mxu0  ;;  %1404 = vmatprep.subr.bf16.mxu0 %v2939_v53  ;;  %v3384_v16 = vpop.f32.mrb[9].mxu1 }
  0xf9   : > { %v585_v4 = vpop.f32.mrb[10].mxu0  ;;  %1329 = vmatprep.mubr.bf16.mxu0 %v875_v62  ;;  %v3390_v21 = vpop.f32.mrb[10].mxu1 }
  0xfa   : > { %v761_v6 = vpack.c.bf16 %v585_v4, %v581_v61  ;;  %v587_v7 = vpop.f32.mrb[11].mxu0  ;;  %1330 = vmatmul.mubr.bf16.gmra.mrb[36].mxu0 %v874_v1  ;;  %v763_v24 = vpack.c.bf16 %v3390_v21, %v3376_v8  ;;  %v3395_v25 = vpop.f32.mrb[11].mxu1 }
  0xfb   : > { %v762_v13 = vpack.c.bf16 %v587_v7, %v583_v0  ;;  %1405 = vmatpush1.bf16.msra.mxu0 %v2937_v63  ;;  %v764_v27 = vpack.c.bf16 %v3395_v25, %v3384_v16  ;;  %v2949_v63 = vld [vmem:[%s3946_s5 + $0x160] ss:$8 sps:$4 sm:$0xff]  }
  0xfc   : > { %v846_v17 = vadd.bf16 %v3291_v18, %v761_v6  ;;  %1406 = vmatprep.subr.bf16.mxu0 %v2942_v3  ;;  %v2954_v3 = vld [vmem:[%s3946_s5 + $0x174] ss:$8 sps:$4 sm:$0xff]  }
  0xfd   : > { %v847_v22 = vadd.bf16 %v3294_v20, %v762_v13  ;;  %v2952_v13 = vld [vmem:[%s3946_s5 + $0x170] ss:$8 sps:$4 sm:$0xff]  }
  0xfe   : > { %v878_v38 = vmax.bf16 %v3015_v2, %v846_v17 }
  0xff   : > { %1407 = vmatpush1.bf16.msra.mxu0 %v2940_v15  ;;  %v591_v31 = vpop.f32.mrb[12].mxu0  ;;  %v879_v34 = vmax.bf16 %v3015_v2, %v847_v22  ;;  %v3416_v44 = vpop.f32.mrb[12].mxu1 }
 0x100   : > { %v593_v37 = vpop.f32.mrb[13].mxu0  ;;  %1408 = vmatprep.subr.bf16.mxu0 %v2945_v19  ;;  %v3421_v48 = vpop.f32.mrb[13].mxu1  ;;  %v2957_v19 = vld [vmem:[%s3946_s5 + $0x184] ss:$8 sps:$4 sm:$0xff]  }
 0x101   : > { %v595_v40 = vpop.f32.mrb[14].mxu0  ;;  %1339 = vmatprep.mubr.bf16.mxu0 %v879_v34  ;;  %v3427_v52 = vpop.f32.mrb[14].mxu1 }
 0x102   : > { %v765_v42 = vpack.c.bf16 %v595_v40, %v591_v31  ;;  %v597_v43 = vpop.f32.mrb[15].mxu0  ;;  %1340 = vmatmul.mubr.bf16.gmra.mrb[40].mxu0 %v878_v38  ;;  %v767_v55 = vpack.c.bf16 %v3427_v52, %v3416_v44  ;;  %v3432_v58 = vpop.f32.mrb[15].mxu1  ;;  %v2955_v38 = vld [vmem:[%s3946_s5 + $0x180] ss:$8 sps:$4 sm:$0xff]  }
 0x103   : > { %v766_v45 = vpack.c.bf16 %v597_v43, %v593_v37  ;;  %1409 = vmatpush1.bf16.msra.mxu0 %v2943_v36  ;;  %v768_v60 = vpack.c.bf16 %v3432_v58, %v3421_v48 }
 0x104   : > { %v850_v49 = vadd.bf16 %v3291_v18, %v765_v42  ;;  %1410 = vmatprep.subr.bf16.mxu0 %v2948_v39 }
 0x105   : > { %v851_v53 = vadd.bf16 %v3294_v20, %v766_v45 }
 0x106   : > { %v882_v1 = vmax.bf16 %v3015_v2, %v850_v49 }
 0x107   : > { %1411 = vmatpush1.bf16.msra.mxu0 %v2946_v46  ;;  %v601_v61 = vpop.f32.mrb[16].mxu0  ;;  %v883_v62 = vmax.bf16 %v3015_v2, %v851_v53  ;;  %v3444_v7 = vpop.f32.mrb[16].mxu1 }
 0x108   : > { %v603_v0 = vpop.f32.mrb[17].mxu0  ;;  %1412 = vmatprep.subr.bf16.mxu0 %v2951_v50  ;;  %v3449_v15 = vpop.f32.mrb[17].mxu1  ;;  %v2958_v50 = vld [vmem:[%s3946_s5 + $0x190] ss:$8 sps:$4 sm:$0xff]  }
 0x109   : > { %v605_v4 = vpop.f32.mrb[18].mxu0  ;;  %1349 = vmatprep.mubr.bf16.mxu0 %v883_v62  ;;  %v3455_v22 = vpop.f32.mrb[18].mxu1  ;;  %v2963_v62 = vld [vmem:[%s3946_s5 + $0x1a4] ss:$8 sps:$4 sm:$0xff]  }
 0x10a   : > { %v769_v5 = vpack.c.bf16 %v605_v4, %v601_v61  ;;  %v607_v6 = vpop.f32.mrb[19].mxu0  ;;  %1350 = vmatmul.mubr.bf16.gmra.mrb[44].mxu0 %v882_v1  ;;  %v771_v29 = vpack.c.bf16 %v3455_v22, %v3444_v7  ;;  %v3460_v31 = vpop.f32.mrb[19].mxu1 }
 0x10b   : > { %v770_v10 = vpack.c.bf16 %v607_v6, %v603_v0  ;;  %1413 = vmatpush1.bf16.msra.mxu0 %v2949_v63  ;;  %v772_v34 = vpack.c.bf16 %v3460_v31, %v3449_v15  ;;  %v2993_v31 = vld [vmem:[%s3947_s6 + $0x78] sm:$0xff]  }
 0x10c   : > { %v854_v17 = vadd.bf16 %v3291_v18, %v769_v5  ;;  %1414 = vmatprep.subr.bf16.mxu0 %v2954_v3  ;;  %2694 = vmatprep.subr.bf16.mxu1 %v2993_v31 }
 0x10d   : > { %v855_v26 = vadd.bf16 %v3294_v20, %v770_v10  ;;  %v2961_v10 = vld [vmem:[%s3946_s5 + $0x1a0] ss:$8 sps:$4 sm:$0xff]  }
 0x10e   : > { %v886_v40 = vmax.bf16 %v3015_v2, %v854_v17 }
 0x10f   : > { %1415 = vmatpush1.bf16.msra.mxu0 %v2952_v13  ;;  %v611_v36 = vpop.f32.mrb[20].mxu0  ;;  %v887_v37 = vmax.bf16 %v3015_v2, %v855_v26  ;;  %v3472_v46 = vpop.f32.mrb[20].mxu1  ;;  %v809_v13 = vcombine.high %v3282_v12, %v3282_v12  ;;  %v2966_v26 = vld [vmem:[%s3946_s5 + $0x1b4] ss:$8 sps:$4 sm:$0xff]   ;;  %v2964_v12 = vld [vmem:[%s3946_s5 + $0x1b0] ss:$8 sps:$4 sm:$0xff]  }
 0x110   : > { %v613_v39 = vpop.f32.mrb[21].mxu0  ;;  %1416 = vmatprep.subr.bf16.mxu0 %v2957_v19  ;;  %v3477_v53 = vpop.f32.mrb[21].mxu1 }
 0x111   : > { %v615_v42 = vpop.f32.mrb[22].mxu0  ;;  %1359 = vmatprep.mubr.bf16.mxu0 %v887_v37  ;;  %v3483_v63 = vpop.f32.mrb[22].mxu1 }
 0x112   : > { %v773_v43 = vpack.c.bf16 %v615_v42, %v611_v36  ;;  %v617_v45 = vpop.f32.mrb[23].mxu0  ;;  %1360 = vmatmul.mubr.bf16.gmra.mrb[48].mxu0 %v886_v40  ;;  %v775_v1 = vpack.c.bf16 %v3483_v63, %v3472_v46  ;;  %v3488_v3 = vpop.f32.mrb[23].mxu1  ;;  %v2995_v46 = vld [vmem:[%s3948_s7] sm:$0xff]  }
 0x113   : > { %v774_v49 = vpack.c.bf16 %v617_v45, %v613_v39  ;;  %1417 = vmatpush1.bf16.msra.mxu0 %v2955_v38  ;;  %v776_v4 = vpack.c.bf16 %v3488_v3, %v3477_v53  ;;  %v2969_v45 = vld [vmem:[%s3946_s5 + $0x1c4] ss:$8 sps:$4 sm:$0xff]  }
 0x114   : > { %v858_v61 = vadd.bf16 %v3291_v18, %v773_v43  ;;  %1418 = vmatprep.subr.bf16.mxu0 %v2960_v41  ;;  %v832_v41 = vpack.i.b16 %v809_v13, %v809_v13  ;;  %v2639_v53 = vld.sshfl [vmem:[%s3950_s9 + $0x4] sm:$0x11 pattern:$0x75316420] }
 0x115   : > { %v859_v0 = vadd.bf16 %v3294_v20, %v774_v49  ;;  %v1537_v63 = vcombine.high %v2639_v53, %v2639_v53 }
 0x116   : > { %v890_v19 = vmax.bf16 %v3015_v2, %v858_v61  ;;  %v3527_v13 = vrot.slane %v832_v41, %v3286_v14 }
 0x117   : > { %1419 = vmatpush1.bf16.msra.mxu0 %v2958_v50  ;;  %v621_v5 = vpop.f32.mrb[24].mxu0  ;;  %v891_v6 = vmax.bf16 %v3015_v2, %v859_v0  ;;  %v3502_v39 = vpop.f32.mrb[24].mxu1  ;;  %v1551_v3 = vrot.slane %v1537_v63, %v3276_v9 }
 0x118   : > { %v623_v17 = vpop.f32.mrb[25].mxu0  ;;  %1420 = vmatprep.subr.bf16.mxu0 %v2963_v62  ;;  %v3507_v42 = vpop.f32.mrb[25].mxu1  ;;  %v853_v57 = vadd.bf16 %v3527_v13, %v768_v60 }
 0x119   : > { %v625_v36 = vpop.f32.mrb[26].mxu0  ;;  %1369 = vmatprep.mubr.bf16.mxu0 %v891_v6  ;;  %v3513_v49 = vpop.f32.mrb[26].mxu1 }
 0x11a   : > { %v777_v37 = vpack.c.bf16 %v625_v36, %v621_v5  ;;  %v627_v38 = vpop.f32.mrb[27].mxu0  ;;  %1370 = vmatmul.mubr.bf16.gmra.mrb[52].mxu0 %v890_v19  ;;  %v779_v61 = vpack.c.bf16 %v3513_v49, %v3502_v39  ;;  %v3518_v62 = vpop.f32.mrb[27].mxu1  ;;  %v808_v36 = vcombine.high %v3279_v11, %v3279_v11  ;;  %v885_v47 = vmax.bf16 %v3015_v2, %v853_v57  ;;  %v2999_v57 = vld [vmem:[%s3948_s7 + $0x20] sm:$0xff]  }
 0x11b   : > { %v778_v40 = vpack.c.bf16 %v627_v38, %v623_v17  ;;  %1421 = vmatpush1.bf16.msra.mxu0 %v2961_v10  ;;  %v780_v0 = vpack.c.bf16 %v3518_v62, %v3507_v42  ;;  %v2967_v10 = vld [vmem:[%s3946_s5 + $0x1c0] ss:$8 sps:$4 sm:$0xff]   ;;  %v1560_v39 = vpack.i.b16 %v1551_v3, %v1551_v3 }
 0x11c   : > { %v862_v43 = vadd.bf16 %v3291_v18, %v777_v37  ;;  %1422 = vmatprep.subr.bf16.mxu0 %v2966_v26  ;;  %v2972_v26 = vld [vmem:[%s3946_s5 + $0x1d4] ss:$8 sps:$4 sm:$0xff]  }
 0x11d   : > { %v863_v50 = vadd.bf16 %v3294_v20, %v778_v40  ;;  %v865_v48 = vadd.bf16 %v3527_v13, %v780_v0  ;;  %v3645_v0 = vrot.slane %v1560_v39, %v3286_v14 }
 0x11e   : > { %v894_v19 = vmax.bf16 %v3015_v2, %v862_v43  ;;  %v2970_v43 = vld [vmem:[%s3946_s5 + $0x1d0] ss:$8 sps:$4 sm:$0xff]  }
 0x11f   : > { %1423 = vmatpush1.bf16.msra.mxu0 %v2964_v12  ;;  %v631_v5 = vpop.f32.mrb[28].mxu0  ;;  %v895_v6 = vmax.bf16 %v3015_v2, %v863_v50  ;;  %v3535_v12 = vpop.f32.mrb[28].mxu1 }
 0x120   : > { %v633_v17 = vpop.f32.mrb[29].mxu0  ;;  %1424 = vmatprep.subr.bf16.mxu0 %v2969_v45  ;;  %v841_v45 = vadd.bf16 %v3527_v13, %v756_v35  ;;  %v3544_v50 = vpop.f32.mrb[29].mxu1 }
 0x121   : > { %v635_v37 = vpop.f32.mrb[30].mxu0  ;;  %1379 = vmatprep.mubr.bf16.mxu0 %v895_v6  ;;  %v2975_v6 = vld [vmem:[%s3946_s5 + $0x1e4] ss:$8 sps:$4 sm:$0xff]  }
 0x122   : > { %v781_v38 = vpack.c.bf16 %v635_v37, %v631_v5  ;;  %v637_v40 = vpop.f32.mrb[31].mxu0  ;;  %1380 = vmatmul.mubr.bf16.gmra.mrb[56].mxu0 %v894_v19  ;;  %v825_v5 = vpack.i.b16 %v808_v36, %v808_v36  ;;  %v873_v35 = vmax.bf16 %v3015_v2, %v841_v45  ;;  %v849_v45 = vadd.bf16 %v3527_v13, %v764_v27 }
 0x123   : > { %v782_v41 = vpack.c.bf16 %v637_v40, %v633_v17  ;;  %1425 = vmatpush1.bf16.msra.mxu0 %v2967_v10  ;;  %v748_v10 = vpop.f32.mrb[30].mxu1  ;;  %v845_v40 = vadd.bf16 %v3527_v13, %v760_v59 }
 0x124   : > { %v866_v11 = vadd.bf16 %v3291_v18, %v781_v38  ;;  %1426 = vmatprep.subr.bf16.mxu0 %v2972_v26  ;;  %v783_v19 = vpack.c.bf16 %v748_v10, %v3535_v12  ;;  %v750_v37 = vpop.f32.mrb[31].mxu1  ;;  %v2973_v18 = vld [vmem:[%s3946_s5 + $0x1e0] ss:$8 sps:$4 sm:$0xff]   ;;  %v830_v26 = vrot.slane %v825_v5, %v3286_v14  ;;  %v2976_v38 = vld [vmem:[%s3946_s5 + $0x1f0] ss:$8 sps:$4 sm:$0xff]   ;;  %v881_v23 = vmax.bf16 %v3015_v2, %v849_v45 }
 0x125   : > { %v867_v17 = vadd.bf16 %v3294_v20, %v782_v41  ;;  %v784_v28 = vpack.c.bf16 %v750_v37, %v3544_v50  ;;  %v2978_v20 = vld [vmem:[%s3946_s5 + $0x1f4] ss:$8 sps:$4 sm:$0xff]   ;;  %v877_v41 = vmax.bf16 %v3015_v2, %v845_v40  ;;  %v2996_v37 = vld [vmem:[%s3948_s7 + $0x8] sm:$0xff]  }
 0x126   : > { %v898_v36 = vmax.bf16 %v3015_v2, %v866_v11  ;;  %v840_v12 = vadd.bf16 %v830_v26, %v755_v32  ;;  %v844_v51 = vadd.bf16 %v830_v26, %v759_v56  ;;  %v848_v32 = vadd.bf16 %v830_v26, %v763_v24 }
 0x127   : > { %1427 = vmatpush1.bf16.msra.mxu0 %v2970_v43  ;;  %v899_v33 = vmax.bf16 %v3015_v2, %v867_v17  ;;  %v852_v54 = vadd.bf16 %v830_v26, %v767_v55  ;;  %v857_v56 = vadd.bf16 %v3527_v13, %v772_v34  ;;  %v856_v21 = vadd.bf16 %v830_v26, %v771_v29  ;;  %v2994_v34 = vld [vmem:[%s3947_s6 + $0x38] sm:$0xff]  }
 0x128   : > { %1428 = vmatprep.subr.bf16.mxu0 %v2975_v6  ;;  %v872_v43 = vmax.bf16 %v3015_v2, %v840_v12  ;;  %v876_v30 = vmax.bf16 %v3015_v2, %v844_v51  ;;  %v880_v59 = vmax.bf16 %v3015_v2, %v848_v32  ;;  %v861_v24 = vadd.bf16 %v3527_v13, %v776_v4 }
 0x129   : > { %1389 = vmatprep.mubr.bf16.mxu0 %v899_v33  ;;  %v884_v8 = vmax.bf16 %v3015_v2, %v852_v54  ;;  %v889_v16 = vmax.bf16 %v3015_v2, %v857_v56  ;;  %v888_v25 = vmax.bf16 %v3015_v2, %v856_v21  ;;  %v860_v44 = vadd.bf16 %v830_v26, %v775_v1 }
 0x12a   : > { %1390 = vmatmul.mubr.bf16.gmra.mrb[60].mxu0 %v898_v36  ;;  %v893_v27 = vmax.bf16 %v3015_v2, %v861_v24  ;;  %v897_v55 = vmax.bf16 %v3015_v2, %v865_v48  ;;  %v864_v58 = vadd.bf16 %v830_v26, %v779_v61  ;;  %v869_v60 = vadd.bf16 %v3527_v13, %v784_v28  ;;  %v2997_v36 = vld [vmem:[%s3948_s7 + $0x10] sm:$0xff]  }
 0x12b   : > { %1429 = vmatpush1.bf16.msra.mxu0 %v2973_v18  ;;  %1432 = vmatprep.mubr.bf16.mxu0 %v873_v35  ;;  %v892_v52 = vmax.bf16 %v3015_v2, %v860_v44  ;;  %v868_v22 = vadd.bf16 %v830_v26, %v783_v19  ;;  %v1544_v1 = vrot.slane %v2639_v53, %v3276_v9 }
 0x12c   : > { %1430 = vmatprep.subr.bf16.mxu0 %v2978_v20  ;;  %v896_v7 = vmax.bf16 %v3015_v2, %v864_v58  ;;  %v901_v15 = vmax.bf16 %v3015_v2, %v869_v60  ;;  %2695 = vmatpush3.bf16.msra.mxu1 %v2994_v34 }
 0x12d   : > { %v900_v29 = vmax.bf16 %v3015_v2, %v868_v22  ;;  %2772 = vmatprep.subr.bf16.mxu1 %v2995_v46  ;;  %v1553_v4 = vpack.i.b16 %v1544_v1, %v1544_v1 }
 0x12f   : > { %1431 = vmatpush1.bf16.msra.mxu0 %v2976_v38  ;;  %v3642_v61 = vrot.slane %v1553_v4, %v3286_v14 }
 0x132   : > { %1433 = vmatmul.mubr.bf16.vlgmr.msra.gmra.mrb[32].mxu0 %v872_v43  ;;  %v2998_v43 = vld [vmem:[%s3948_s7 + $0x18] sm:$0xff]  }
 0x133   : > { %1442 = vmatprep.mubr.bf16.mxu0 %v877_v41 }
 0x13a   : > { %1443 = vmatmul.mubr.bf16.gmra.mrb[36].mxu0 %v876_v30 }
 0x13b   : > { %1452 = vmatprep.mubr.bf16.mxu0 %v881_v23 }
 0x142   : > { %1453 = vmatmul.mubr.bf16.gmra.mrb[40].mxu0 %v880_v59 }
 0x143   : > { %1462 = vmatprep.mubr.bf16.mxu0 %v885_v47 }
 0x14a   : > { %1463 = vmatmul.mubr.bf16.gmra.mrb[44].mxu0 %v884_v8 }
 0x14b   : > { %1472 = vmatprep.mubr.bf16.mxu0 %v889_v16  ;;  %v3000_v16 = vld [vmem:[%s3948_s7 + $0x28] sm:$0xff]  }
 0x152   : > { %1473 = vmatmul.mubr.bf16.gmra.mrb[48].mxu0 %v888_v25 }
 0x153   : > { %1482 = vmatprep.mubr.bf16.mxu0 %v893_v27 }
 0x15a   : > { %1483 = vmatmul.mubr.bf16.gmra.mrb[52].mxu0 %v892_v52 }
 0x15b   : > { %1492 = vmatprep.mubr.bf16.mxu0 %v897_v55 }
 0x162   : > { %1493 = vmatmul.mubr.bf16.gmra.mrb[56].mxu0 %v896_v7 }
 0x163   : > { %1502 = vmatprep.mubr.bf16.mxu0 %v901_v15 }
 0x16a   : > { %1503 = vmatmul.mubr.bf16.gmra.mrb[60].mxu0 %v900_v29 }
 0x205   : > { %v1434_v42 = vpop.f32.mrb[32].mxu0 }
 0x206   : > { %v1436_v49 = vpop.f32.mrb[33].mxu0 }
 0x207   : > { %v1438_v62 = vpop.f32.mrb[34].mxu0 }
 0x208   : > { %v1513_v13 = vpack.c.bf16 %v1438_v62, %v1434_v42  ;;  %v1440_v50 = vpop.f32.mrb[35].mxu0 }
 0x209   : > { %v1514_v11 = vpack.c.bf16 %v1440_v50, %v1436_v49 }
 0x20a   : > { %v1566_v5 = vadd.bf16 %v3642_v61, %v1513_v13 }
 0x20b   : > { %v1567_v6 = vadd.bf16 %v3645_v0, %v1514_v11 }
 0x20c   : > { %v1582_v17 = vmax.bf16 %v3015_v2, %v1566_v5 }
 0x20d   : > { %v1444_v10 = vpop.f32.mrb[36].mxu0  ;;  %v1583_v9 = vmax.bf16 %v3015_v2, %v1567_v6 }
 0x20e   : > { %v1446_v19 = vpop.f32.mrb[37].mxu0 }
 0x20f   : > { %v1448_v28 = vpop.f32.mrb[38].mxu0  ;;  %1759 = vmatprep.mubr.bf16.mxu1 %v1583_v9 }
 0x210   : > { %v1515_v33 = vpack.c.bf16 %v1448_v28, %v1444_v10  ;;  %v1450_v18 = vpop.f32.mrb[39].mxu0  ;;  %1760 = vmatmul.mubr.bf16.vlgmr.msra.gmra.mrb[32].mxu1 %v1582_v17 }
 0x211   : > { %v1516_v35 = vpack.c.bf16 %v1450_v18, %v1446_v19  ;;  %2773 = vmatpush3.bf16.msra.mxu1 %v2995_v46 }
 0x212   : > { %v1568_v26 = vadd.bf16 %v3642_v61, %v1515_v33  ;;  %2774 = vmatprep.subr.bf16.mxu1 %v2996_v37 }
 0x213   : > { %v1569_v20 = vadd.bf16 %v3645_v0, %v1516_v35 }
 0x214   : > { %v1584_v41 = vmax.bf16 %v3015_v2, %v1568_v26 }
 0x215   : > { %v1454_v38 = vpop.f32.mrb[40].mxu0  ;;  %v1585_v40 = vmax.bf16 %v3015_v2, %v1569_v20  ;;  %2775 = vmatpush3.bf16.msra.mxu1 %v2996_v37 }
 0x216   : > { %v1456_v12 = vpop.f32.mrb[41].mxu0  ;;  %2776 = vmatprep.subr.bf16.mxu1 %v2997_v36 }
 0x217   : > { %v1458_v45 = vpop.f32.mrb[42].mxu0  ;;  %1767 = vmatprep.mubr.bf16.mxu1 %v1585_v40 }
 0x218   : > { %v1517_v51 = vpack.c.bf16 %v1458_v45, %v1454_v38  ;;  %v1460_v23 = vpop.f32.mrb[43].mxu0  ;;  %1768 = vmatmul.mubr.bf16.gmra.mrb[36].mxu1 %v1584_v41  ;;  %v3001_v45 = vld [vmem:[%s3948_s7 + $0x30] sm:$0xff]  }
 0x219   : > { %v1518_v30 = vpack.c.bf16 %v1460_v23, %v1456_v12  ;;  %2777 = vmatpush3.bf16.msra.mxu1 %v2997_v36 }
 0x21a   : > { %v1570_v32 = vadd.bf16 %v3642_v61, %v1517_v51  ;;  %2778 = vmatprep.subr.bf16.mxu1 %v2998_v43  ;;  %v3002_v51 = vld [vmem:[%s3948_s7 + $0x38] sm:$0xff]  }
 0x21b   : > { %v1571_v59 = vadd.bf16 %v3645_v0, %v1518_v30 }
 0x21c   : > { %v1586_v8 = vmax.bf16 %v3015_v2, %v1570_v32 }
 0x21d   : > { %v1464_v47 = vpop.f32.mrb[44].mxu0  ;;  %v1587_v54 = vmax.bf16 %v3015_v2, %v1571_v59  ;;  %2779 = vmatpush3.bf16.msra.mxu1 %v2998_v43 }
 0x21e   : > { %v1466_v56 = vpop.f32.mrb[45].mxu0  ;;  %2780 = vmatprep.subr.bf16.mxu1 %v2999_v57 }
 0x21f   : > { %v1468_v21 = vpop.f32.mrb[46].mxu0  ;;  %1775 = vmatprep.mubr.bf16.mxu1 %v1587_v54 }
 0x220   : > { %v1519_v24 = vpack.c.bf16 %v1468_v21, %v1464_v47  ;;  %v1470_v25 = vpop.f32.mrb[47].mxu0  ;;  %1776 = vmatmul.mubr.bf16.gmra.mrb[40].mxu1 %v1586_v8 }
 0x221   : > { %v1520_v27 = vpack.c.bf16 %v1470_v25, %v1466_v56  ;;  %2781 = vmatpush3.bf16.msra.mxu1 %v2999_v57 }
 0x222   : > { %v1572_v44 = vadd.bf16 %v3642_v61, %v1519_v24  ;;  %2782 = vmatprep.subr.bf16.mxu1 %v3000_v16 }
 0x223   : > { %v1573_v48 = vadd.bf16 %v3645_v0, %v1520_v27 }
 0x224   : > { %v1588_v60 = vmax.bf16 %v3015_v2, %v1572_v44 }
 0x225   : > { %v1474_v52 = vpop.f32.mrb[48].mxu0  ;;  %v1589_v55 = vmax.bf16 %v3015_v2, %v1573_v48  ;;  %2783 = vmatpush3.bf16.msra.mxu1 %v3000_v16 }
 0x226   : > { %v1476_v58 = vpop.f32.mrb[49].mxu0  ;;  %2784 = vmatprep.subr.bf16.mxu1 %v3001_v45 }
 0x227   : > { %v1478_v7 = vpop.f32.mrb[50].mxu0  ;;  %1783 = vmatprep.mubr.bf16.mxu1 %v1589_v55 }
 0x228   : > { %v1521_v15 = vpack.c.bf16 %v1478_v7, %v1474_v52  ;;  %v1480_v22 = vpop.f32.mrb[51].mxu0  ;;  %1784 = vmatmul.mubr.bf16.gmra.mrb[44].mxu1 %v1588_v60 }
 0x229   : > { %v1522_v29 = vpack.c.bf16 %v1480_v22, %v1476_v58  ;;  %2785 = vmatpush3.bf16.msra.mxu1 %v3001_v45 }
 0x22a   : > { %v1574_v31 = vadd.bf16 %v3642_v61, %v1521_v15  ;;  %2786 = vmatprep.subr.bf16.mxu1 %v3002_v51 }
 0x22b   : > { %v1575_v34 = vadd.bf16 %v3645_v0, %v1522_v29 }
 0x22c   : > { %v1590_v1 = vmax.bf16 %v3015_v2, %v1574_v31  ;;  %v3004_v31 = vld [vmem:[%s3949_s8 + $0x8] sm:$0xff]  }
 0x22d   : > { %v1484_v46 = vpop.f32.mrb[52].mxu0  ;;  %v1591_v53 = vmax.bf16 %v3015_v2, %v1575_v34  ;;  %2787 = vmatpush3.bf16.msra.mxu1 %v3002_v51 }
 0x22e   : > { %v1486_v63 = vpop.f32.mrb[53].mxu0 }
 0x22f   : > { %v1488_v3 = vpop.f32.mrb[54].mxu0  ;;  %1791 = vmatprep.mubr.bf16.mxu1 %v1591_v53 }
 0x230   : > { %v1523_v4 = vpack.c.bf16 %v1488_v3, %v1484_v46  ;;  %v1490_v39 = vpop.f32.mrb[55].mxu0  ;;  %1792 = vmatmul.mubr.bf16.gmra.mrb[48].mxu1 %v1590_v1 }
 0x231   : > { %v1524_v42 = vpack.c.bf16 %v1490_v39, %v1486_v63  ;;  %v3005_v63 = vld [vmem:[%s3949_s8 + $0x10] sm:$0xff]  }
 0x232   : > { %v1576_v49 = vadd.bf16 %v3642_v61, %v1523_v4 }
 0x233   : > { %v1577_v62 = vadd.bf16 %v3645_v0, %v1524_v42 }
 0x234   : > { %v1592_v5 = vmax.bf16 %v3015_v2, %v1576_v49 }
 0x235   : > { %v1494_v13 = vpop.f32.mrb[56].mxu0  ;;  %v1593_v50 = vmax.bf16 %v3015_v2, %v1577_v62 }
 0x236   : > { %v1496_v11 = vpop.f32.mrb[57].mxu0 }
 0x237   : > { %v1498_v6 = vpop.f32.mrb[58].mxu0  ;;  %1799 = vmatprep.mubr.bf16.mxu1 %v1593_v50 }
 0x238   : > { %v1525_v10 = vpack.c.bf16 %v1498_v6, %v1494_v13  ;;  %v1500_v9 = vpop.f32.mrb[59].mxu0  ;;  %1800 = vmatmul.mubr.bf16.gmra.mrb[52].mxu1 %v1592_v5 }
 0x239   : > { %v1526_v17 = vpack.c.bf16 %v1500_v9, %v1496_v11 }
 0x23a   : > { %v1578_v19 = vadd.bf16 %v3642_v61, %v1525_v10 }
 0x23b   : > { %v1579_v37 = vadd.bf16 %v3645_v0, %v1526_v17 }
 0x23c   : > { %v1594_v35 = vmax.bf16 %v3015_v2, %v1578_v19 }
 0x23d   : > { %v1504_v28 = vpop.f32.mrb[60].mxu0  ;;  %v1595_v33 = vmax.bf16 %v3015_v2, %v1579_v37 }
 0x23e   : > { %v1506_v18 = vpop.f32.mrb[61].mxu0 }
 0x23f   : > { %v1508_v26 = vpop.f32.mrb[62].mxu0  ;;  %1807 = vmatprep.mubr.bf16.mxu1 %v1595_v33 }
 0x240   : > { %v1527_v36 = vpack.c.bf16 %v1508_v26, %v1504_v28  ;;  %v1510_v20 = vpop.f32.mrb[63].mxu0  ;;  %1808 = vmatmul.mubr.bf16.gmra.mrb[56].mxu1 %v1594_v35 }
 0x241   : > { %v1528_v38 = vpack.c.bf16 %v1510_v20, %v1506_v18 }
 0x242   : > { %v1580_v40 = vadd.bf16 %v3642_v61, %v1527_v36  ;;  %v3003_v61 = vld [vmem:[%s3949_s8] sm:$0xff]  }
 0x243   : > { %v1581_v12 = vadd.bf16 %v3645_v0, %v1528_v38  ;;  %2804 = vmatprep.subr.bf16.mxu1 %v3003_v61  ;;  %v1598_v0 = vld [vmem:[%s3950_s9 + $0x6] sm:$0x1] }
 0x244   : > { %v1596_v43 = vmax.bf16 %v3015_v2, %v1580_v40  ;;  %v1833_v30 = vpack.i.b16 %v1598_v0, %v1598_v0 }
 0x245   : > { %v1597_v41 = vmax.bf16 %v3015_v2, %v1581_v12 }
 0x246   : > { %v3707_v56 = vrot.slane %v1833_v30, %v3286_v14 }
 0x247   : > { %1815 = vmatprep.mubr.bf16.mxu1 %v1597_v41 }
 0x248   : > { %1816 = vmatmul.mubr.bf16.gmra.mrb[60].mxu1 %v1596_v43 }
 0x2e3   : > { %v2696_v23 = vpop.f32.mrb[32].mxu1 }
 0x2e4   : > { %v2697_v32 = vpop.f32.mrb[33].mxu1 }
 0x2e5   : > { %v2698_v57 = vadd.f32 %v2697_v32, %v2696_v23  ;;  %v2699_v59 = vpop.f32.mrb[34].mxu1 }
 0x2e6   : > { %v2700_v47 = vpop.f32.mrb[35].mxu1 }
 0x2e7   : > { %v2701_v54 = vadd.f32 %v2700_v47, %v2699_v59 }
 0x2e9   : > { %v1824_v8 = vpack.c.bf16 %v2701_v54, %v2698_v57 }
 0x2eb   : > { %v1839_v16 = vadd.bf16 %v3707_v56, %v1824_v8  ;;  %v2702_v21 = vpop.f32.mrb[36].mxu1 }
 0x2ec   : > { %v2703_v24 = vpop.f32.mrb[37].mxu1 }
 0x2ed   : > { %v2704_v25 = vadd.f32 %v2703_v24, %v2702_v21  ;;  %v2705_v27 = vpop.f32.mrb[38].mxu1  ;;  %v1847_v44 = vmax.bf16 %v3015_v2, %v1839_v16 }
 0x2ee   : > { %v2706_v48 = vpop.f32.mrb[39].mxu1 }
 0x2ef   : > { %v2707_v52 = vadd.f32 %v2706_v48, %v2705_v27  ;;  %2788 = vmatprep.mubr.bf16.mxu1 %v1847_v44  ;;  %v3006_v48 = vld [vmem:[%s3949_s8 + $0x18] sm:$0xff]  }
 0x2f1   : > { %v1825_v55 = vpack.c.bf16 %v2707_v52, %v2704_v25  ;;  %v1855_v52 = vld [vmem:[%s3950_s9 + $0x7] sm:$0x1] }
 0x2f3   : > { %v1840_v58 = vadd.bf16 %v3707_v56, %v1825_v55  ;;  %v2708_v60 = vpop.f32.mrb[40].mxu1  ;;  %v2026_v55 = vpack.i.b16 %v1855_v52, %v1855_v52 }
 0x2f4   : > { %v2709_v7 = vpop.f32.mrb[41].mxu1 }
 0x2f5   : > { %v1848_v15 = vmax.bf16 %v3015_v2, %v1840_v58  ;;  %v2710_v22 = vadd.f32 %v2709_v7, %v2708_v60  ;;  %v2711_v29 = vpop.f32.mrb[42].mxu1  ;;  %v2031_v7 = vrot.slane %v2026_v55, %v3286_v14 }
 0x2f6   : > { %v2712_v34 = vpop.f32.mrb[43].mxu1 }
 0x2f7   : > { %v2713_v46 = vadd.f32 %v2712_v34, %v2711_v29  ;;  %2789 = vmatmul.mubr.bf16.vlgmr.msra.gmra.mrb[64].mxu1 %v1848_v15 }
 0x2f8   : > { %2805 = vmatpush3.bf16.msra.mxu1 %v3003_v61 }
 0x2f9   : > { %v1826_v53 = vpack.c.bf16 %v2713_v46, %v2710_v22  ;;  %2806 = vmatprep.subr.bf16.mxu1 %v3004_v31 }
 0x2fb   : > { %v1841_v1 = vadd.bf16 %v3707_v56, %v1826_v53  ;;  %v2714_v3 = vpop.f32.mrb[44].mxu1 }
 0x2fc   : > { %v2715_v4 = vpop.f32.mrb[45].mxu1  ;;  %2807 = vmatpush3.bf16.msra.mxu1 %v3004_v31 }
 0x2fd   : > { %v2716_v39 = vadd.f32 %v2715_v4, %v2714_v3  ;;  %v2717_v42 = vpop.f32.mrb[46].mxu1  ;;  %v1849_v49 = vmax.bf16 %v3015_v2, %v1841_v1  ;;  %2808 = vmatprep.subr.bf16.mxu1 %v3005_v63 }
 0x2fe   : > { %v2718_v62 = vpop.f32.mrb[47].mxu1 }
 0x2ff   : > { %v2719_v13 = vadd.f32 %v2718_v62, %v2717_v42  ;;  %2792 = vmatprep.mubr.bf16.mxu1 %v1849_v49 }
 0x300   : > { %2809 = vmatpush3.bf16.msra.mxu1 %v3005_v63 }
 0x301   : > { %v1827_v50 = vpack.c.bf16 %v2719_v13, %v2716_v39  ;;  %2810 = vmatprep.subr.bf16.mxu1 %v3006_v48 }
 0x303   : > { %v1842_v11 = vadd.bf16 %v3707_v56, %v1827_v50  ;;  %v2720_v5 = vpop.f32.mrb[48].mxu1 }
 0x304   : > { %v2721_v6 = vpop.f32.mrb[49].mxu1  ;;  %2811 = vmatpush3.bf16.msra.mxu1 %v3006_v48 }
 0x305   : > { %v2722_v10 = vadd.f32 %v2721_v6, %v2720_v5  ;;  %v2723_v9 = vpop.f32.mrb[50].mxu1  ;;  %v1850_v17 = vmax.bf16 %v3015_v2, %v1842_v11 }
 0x306   : > { %v2724_v19 = vpop.f32.mrb[51].mxu1 }
 0x307   : > { %v2725_v37 = vadd.f32 %v2724_v19, %v2723_v9  ;;  %2793 = vmatmul.mubr.bf16.gmra.mrb[68].mxu1 %v1850_v17 }
 0x309   : > { %v1828_v28 = vpack.c.bf16 %v2725_v37, %v2722_v10 }
 0x30b   : > { %v1843_v33 = vadd.bf16 %v3707_v56, %v1828_v28  ;;  %v2726_v18 = vpop.f32.mrb[52].mxu1 }
 0x30c   : > { %v2727_v35 = vpop.f32.mrb[53].mxu1 }
 0x30d   : > { %v2728_v26 = vadd.f32 %v2727_v35, %v2726_v18  ;;  %v2729_v36 = vpop.f32.mrb[54].mxu1  ;;  %v1851_v20 = vmax.bf16 %v3015_v2, %v1843_v33 }
 0x30e   : > { %v2730_v38 = vpop.f32.mrb[55].mxu1 }
 0x30f   : > { %v2731_v40 = vadd.f32 %v2730_v38, %v2729_v36  ;;  %2796 = vmatprep.mubr.bf16.mxu1 %v1851_v20 }
 0x311   : > { %v1829_v12 = vpack.c.bf16 %v2731_v40, %v2728_v26 }
 0x313   : > { %v1844_v41 = vadd.bf16 %v3707_v56, %v1829_v12  ;;  %v2732_v43 = vpop.f32.mrb[56].mxu1 }
 0x314   : > { %v2733_v45 = vpop.f32.mrb[57].mxu1 }
 0x315   : > { %v2734_v51 = vadd.f32 %v2733_v45, %v2732_v43  ;;  %v2735_v61 = vpop.f32.mrb[58].mxu1  ;;  %v1852_v0 = vmax.bf16 %v3015_v2, %v1844_v41  ;;  %v3757_v43 = vld [vmem:[%s3951_s10] ss:$0 sm:$0xff] }
 0x316   : > { %v2736_v23 = vpop.f32.mrb[59].mxu1 }
 0x317   : > { %v2737_v30 = vadd.f32 %v2736_v23, %v2735_v61  ;;  %2797 = vmatmul.mubr.bf16.gmra.mrb[72].mxu1 %v1852_v0 }
 0x319   : > { %v1830_v32 = vpack.c.bf16 %v2737_v30, %v2734_v51 }
 0x31b   : > { %v1845_v57 = vadd.bf16 %v3707_v56, %v1830_v32  ;;  %v2738_v59 = vpop.f32.mrb[60].mxu1 }
 0x31c   : > { %v2739_v47 = vpop.f32.mrb[61].mxu1 }
 0x31d   : > { %v2740_v54 = vadd.f32 %v2739_v47, %v2738_v59  ;;  %v2741_v8 = vpop.f32.mrb[62].mxu1  ;;  %v1853_v16 = vmax.bf16 %v3015_v2, %v1845_v57 }
 0x31e   : > { %v2742_v21 = vpop.f32.mrb[63].mxu1 }
 0x31f   : > { %v2743_v24 = vadd.f32 %v2742_v21, %v2741_v8  ;;  %2800 = vmatprep.mubr.bf16.mxu1 %v1853_v16  ;;  %v431_v16 = vld [vmem:[%s3775_s13 + $0x20] sm:$0xff] }
 0x321   : > { %v1831_v25 = vpack.c.bf16 %v2743_v24, %v2740_v54 }
 0x323   : > { %v1846_v27 = vadd.bf16 %v3707_v56, %v1831_v25 }
 0x325   : > { %v1854_v44 = vmax.bf16 %v3015_v2, %v1846_v27 }
 0x327   : > { %2801 = vmatmul.mubr.bf16.gmra.mrb[76].mxu1 %v1854_v44  ;;  %v432_v44 = vld [vmem:[%s3775_s13 + $0x28] sm:$0xff] }
 0x3ca   : > { %v2790_v58 = vpop.f32.mrb[64].mxu1 }
 0x3cb   : > { %v1954_v60 = vpop.f32.mrb[65].mxu1 }
 0x3cc   : > { %v2791_v15 = vpop.f32.mrb[66].mxu1 }
 0x3cd   : > { %v2018_v56 = vpack.c.bf16 %v2791_v15, %v2790_v58  ;;  %v1957_v22 = vpop.f32.mrb[67].mxu1 }
 0x3ce   : > { %v2017_v29 = vpack.c.bf16 %v1957_v22, %v1954_v60  ;;  %v427_v22 = vld [vmem:[%s3775_s13] sm:$0xff] }
 0x3cf   : > { %v2033_v31 = vadd.bf16 %v2031_v7, %v2018_v56  ;;  %v3794_v56 = vld [vmem:[%s3943_s2] ss:$0 sm:$0xff] }
 0x3d0   : > { %v2032_v34 = vadd.bf16 %v2031_v7, %v2017_v29 }
 0x3d1   : > { %v2041_v53 = vmax.bf16 %v3015_v2, %v2033_v31 }
 0x3d2   : > { %v2040_v46 = vmax.bf16 %v3015_v2, %v2032_v34 }
 0x3d4   : > { %2812 = vmatprep.mubr.msk.bf16.mxu1 %vm2087_vm1, %v2040_v46 }
 0x3d5   : > { %2813 = vmatmul.mubr.msk.bf16.vlgmr.msra.gmra.mrb[80].mxu1 %vm2087_vm1, %v2041_v53 }
 0x3da   : > { %v2794_v63 = vpop.f32.mrb[68].mxu1 }
 0x3db   : > { %v1970_v1 = vpop.f32.mrb[69].mxu1 }
 0x3dc   : > { %v2795_v3 = vpop.f32.mrb[70].mxu1 }
 0x3dd   : > { %v2020_v4 = vpack.c.bf16 %v2795_v3, %v2794_v63  ;;  %v1973_v14 = vpop.f32.mrb[71].mxu1  ;;  %v430_v3 = vld [vmem:[%s3775_s13 + $0x18] sm:$0xff] }
 0x3de   : > { %v2019_v39 = vpack.c.bf16 %v1973_v14, %v1970_v1  ;;  %v428_v14 = vld [vmem:[%s3775_s13 + $0x8] sm:$0xff] }
 0x3df   : > { %v2035_v42 = vadd.bf16 %v2031_v7, %v2020_v4 }
 0x3e0   : > { %v2034_v49 = vadd.bf16 %v2031_v7, %v2019_v39 }
 0x3e1   : > { %v2043_v13 = vmax.bf16 %v3015_v2, %v2035_v42 }
 0x3e2   : > { %v2042_v62 = vmax.bf16 %v3015_v2, %v2034_v49 }
 0x3e4   : > { %2816 = vmatprep.mubr.msk.bf16.mxu1 %vm2087_vm1, %v2042_v62 }
 0x3e5   : > { %2817 = vmatmul.mubr.msk.bf16.gmra.mrb[84].mxu1 %vm2087_vm1, %v2043_v13 }
 0x3ea   : > { %v2798_v50 = vpop.f32.mrb[72].mxu1 }
 0x3eb   : > { %v1986_v11 = vpop.f32.mrb[73].mxu1 }
 0x3ec   : > { %v2799_v5 = vpop.f32.mrb[74].mxu1 }
 0x3ed   : > { %v2022_v6 = vpack.c.bf16 %v2799_v5, %v2798_v50  ;;  %v1989_v10 = vpop.f32.mrb[75].mxu1 }
 0x3ee   : > { %v2021_v9 = vpack.c.bf16 %v1989_v10, %v1986_v11 }
 0x3ef   : > { %v2037_v17 = vadd.bf16 %v2031_v7, %v2022_v6  ;;  %v437_v6 = vld [vmem:[%s3775_s13 + $0x50] sm:$0xff] }
 0x3f0   : > { %v2036_v19 = vadd.bf16 %v2031_v7, %v2021_v9 }
 0x3f1   : > { %v2045_v28 = vmax.bf16 %v3015_v2, %v2037_v17 }
 0x3f2   : > { %v2044_v37 = vmax.bf16 %v3015_v2, %v2036_v19  ;;  %v435_v19 = vld [vmem:[%s3775_s13 + $0x40] sm:$0xff] }
 0x3f4   : > { %2820 = vmatprep.mubr.msk.bf16.mxu1 %vm2087_vm1, %v2044_v37 }
 0x3f5   : > { %2821 = vmatmul.mubr.msk.bf16.gmra.mrb[88].mxu1 %vm2087_vm1, %v2045_v28 }
 0x3fa   : > { %v2802_v33 = vpop.f32.mrb[76].mxu1 }
 0x3fb   : > { %v2002_v18 = vpop.f32.mrb[77].mxu1 }
 0x3fc   : > { %v2803_v35 = vpop.f32.mrb[78].mxu1 }
 0x3fd   : > { %v2024_v26 = vpack.c.bf16 %v2803_v35, %v2802_v33  ;;  %v2005_v36 = vpop.f32.mrb[79].mxu1 }
 0x3fe   : > { %v2023_v20 = vpack.c.bf16 %v2005_v36, %v2002_v18  ;;  %v438_v18 = vld [vmem:[%s3775_s13 + $0x58] sm:$0xff] }
 0x3ff   : > { %v2039_v38 = vadd.bf16 %v2031_v7, %v2024_v26 }
 0x400   : > { %v2038_v40 = vadd.bf16 %v2031_v7, %v2023_v20  ;;  %v429_v7 = vld [vmem:[%s3775_s13 + $0x10] sm:$0xff] }
 0x401   : > { %v2047_v41 = vmax.bf16 %v3015_v2, %v2039_v38 }
 0x402   : > { %v2046_v12 = vmax.bf16 %v3015_v2, %v2038_v40  ;;  %v436_v40 = vld [vmem:[%s3775_s13 + $0x48] sm:$0xff] }
 0x404   : > { %2824 = vmatprep.mubr.msk.bf16.mxu1 %vm2087_vm1, %v2046_v12 }
 0x405   : > { %2825 = vmatmul.mubr.msk.bf16.gmra.mrb[92].mxu1 %vm2087_vm1, %v2047_v41 }
 0x4a8   : > { %v2814_v45 = vpop.f32.mrb[80].mxu1 }
 0x4a9   : > { %v2155_v51 = vadd.f32 %v2814_v45, %v3757_v43  ;;  %v2146_v61 = vpop.f32.mrb[81].mxu1 }
 0x4aa   : > { %v2815_v0 = vpop.f32.mrb[82].mxu1  ;;  %v2147_v30 = vadd.f32 %v3757_v43, %v2146_v61 }
 0x4ab   : > { %2381 = vrot.lane.b32.xlu0 %v2155_v51, %s3017_s29  ;;  %v2149_v23 = vpop.f32.mrb[83].mxu1  ;;  %v2158_v32 = vadd.f32 %v2815_v0, %v3757_v43  ;;  %v2211_v55 = vmax.f32 %v2155_v51, 0.0 }
 0x4ac   : > { %v2150_v2 = vadd.f32 %v3757_v43, %v2149_v23  ;;  %v2209_v15 = vmax.f32 %v2147_v30, 0.0 }
 0x4ad   : > { %v2227_v34 = vsub.f32 %v429_v7, %v2211_v55  ;;  %v2212_v46 = vmax.f32 %v2158_v32, 0.0 }
 0x4ae   : > { %2379 = vrot.lane.b32.xlu1 %v2150_v2, %s3017_s29  ;;  %v2225_v1 = vsub.f32 %v427_v22, %v2209_v15  ;;  %v2210_v4 = vmax.f32 %v2150_v2, 0.0 }
 0x4af   : > { %2377 = vrot.lane.b32.xlu0 %v2147_v30, %s3017_s29  ;;  %v2228_v42 = vsub.f32 %v430_v3, %v2212_v46  ;;  %v2243_v62 = vmul.f32 %v2227_v34, %v2227_v34  ;;  %v441_v34 = vld [vmem:[%s3775_s13 + $0x70] sm:$0xff]  ;;  %v439_v3 = vld [vmem:[%s3775_s13 + $0x60] sm:$0xff] }
 0x4b0   : > { %v2226_v13 = vsub.f32 %v428_v14, %v2210_v4  ;;  %v2241_v5 = vmul.f32 %v2225_v1, %v2225_v1 }
 0x4b1   : > { %v2265_v26 = vmul.f32 %v3794_v56, %v2243_v62  ;;  %v2244_v36 = vmul.f32 %v2228_v42, %v2228_v42 }
 0x4b2   : > { %v2263_v12 = vmul.f32 %v3794_v56, %v2241_v5  ;;  %v2242_v41 = vmul.f32 %v2226_v13, %v2226_v13  ;;  %v440_v5 = vld [vmem:[%s3775_s13 + $0x68] sm:$0xff] }
 0x4b3   : > { %2383 = vrot.lane.b32.xlu0 %v2158_v32, %s3017_s29  ;;  %v2286_v2 = vsel %vm2279_vm2, %v2265_v26, 0.0  ;;  %v2266_v30 = vmul.f32 %v3794_v56, %v2244_v36 }
 0x4b8   : > { %v2818_v57 = vpop.f32.mrb[84].mxu1 }
 0x4b9   : > { %v3768_v59 = vadd.f32 %v2818_v57, %v3757_v43  ;;  %v2162_v47 = vpop.f32.mrb[85].mxu1  ;;  %v2280_v57 = vsel %vm2279_vm2, %v2263_v12, 0.0 }
 0x4ba   : > { %v3778_v54 = vadd.f32 %v3757_v43, %v2162_v47  ;;  %v2819_v8 = vpop.f32.mrb[86].mxu1  ;;  %v2264_v47 = vmul.f32 %v3794_v56, %v2242_v41 }
 0x4bb   : > { %v3782_v21 = vadd.f32 %v2819_v8, %v3757_v43  ;;  %v2165_v24 = vpop.f32.mrb[87].mxu1 }
 0x4bc   : > { %v2213_v25 = vmax.f32 %v3778_v54, 0.0  ;;  %v3786_v27 = vadd.f32 %v3757_v43, %v2165_v24 }
 0x4be   : > { %v2229_v48 = vsub.f32 %v431_v16, %v2213_v25  ;;  %v2214_v52 = vmax.f32 %v3786_v27, 0.0 }
 0x4c0   : > { %v2230_v58 = vsub.f32 %v432_v44, %v2214_v52  ;;  %v2245_v60 = vmul.f32 %v2229_v48, %v2229_v48 }
 0x4c2   : > { %v2246_v29 = vmul.f32 %v2230_v58, %v2230_v58  ;;  %v2267_v31 = vmul.f32 %v3794_v56, %v2245_v60  ;;  %v2289_v58 = vsel %vm2279_vm2, %v2266_v30, 0.0  ;;  %v2283_v60 = vsel %vm2279_vm2, %v2264_v47, 0.0 }
 0x4c4   : > { %v2268_v53 = vmul.f32 %v3794_v56, %v2246_v29  ;;  %v3800_v63 = vsel %vm2279_vm2, %v2267_v31, 0.0 }
 0x4c6   : > { %v3805_v39 = vsel %vm2279_vm2, %v2268_v53, 0.0 }
 0x4c8   : > { %v2822_v49 = vpop.f32.mrb[88].mxu1 }
 0x4c9   : > { %v3808_v50 = vadd.f32 %v2822_v49, %v3757_v43  ;;  %v2178_v11 = vpop.f32.mrb[89].mxu1  ;;  %v442_v49 = vld [vmem:[%s3775_s13 + $0x78] sm:$0xff] }
 0x4ca   : > { %v3812_v10 = vadd.f32 %v3757_v43, %v2178_v11  ;;  %v2823_v9 = vpop.f32.mrb[90].mxu1 }
 0x4cb   : > { %v2219_v17 = vmax.f32 %v3808_v50, 0.0  ;;  %v3817_v37 = vadd.f32 %v2823_v9, %v3757_v43  ;;  %v2181_v28 = vpop.f32.mrb[91].mxu1 }
 0x4cc   : > { %v2217_v33 = vmax.f32 %v3812_v10, 0.0  ;;  %v3822_v35 = vadd.f32 %v3757_v43, %v2181_v28 }
 0x4cd   : > { %v2235_v20 = vsub.f32 %v437_v6, %v2219_v17  ;;  %v2220_v38 = vmax.f32 %v3817_v37, 0.0 }
 0x4ce   : > { %v2233_v45 = vsub.f32 %v435_v19, %v2217_v33  ;;  %v2218_v51 = vmax.f32 %v3822_v35, 0.0 }
 0x4cf   : > { %v2236_v61 = vsub.f32 %v438_v18, %v2220_v38  ;;  %v2251_v0 = vmul.f32 %v2235_v20, %v2235_v20 }
 0x4d0   : > { %v2234_v23 = vsub.f32 %v436_v40, %v2218_v51  ;;  %v2249_v32 = vmul.f32 %v2233_v45, %v2233_v45  ;;  %v2215_v51 = vmax.f32 %v3768_v59, 0.0 }
 0x4d1   : > { %v2273_v8 = vmul.f32 %v3794_v56, %v2251_v0  ;;  %v2252_v16 = vmul.f32 %v2236_v61, %v2236_v61  ;;  %v2216_v61 = vmax.f32 %v3782_v21, 0.0  ;;  %v433_v0 = vld [vmem:[%s3775_s13 + $0x30] sm:$0xff] }
 0x4d2   : > { %2287 = vadd.xlane.f32.xlu1 %v2286_v2  ;;  %2281 = vadd.xlane.f32.xlu0 %v2280_v57  ;;  %v2271_v24 = vmul.f32 %v3794_v56, %v2249_v32  ;;  %v2250_v25 = vmul.f32 %v2234_v23, %v2234_v23  ;;  %v434_v23 = vld [vmem:[%s3775_s13 + $0x38] sm:$0xff]  ;;  %v2231_v2 = vsub.f32 %v433_v0, %v2215_v51 }
 0x4d3   : > { %v3836_v44 = vsel %vm2279_vm2, %v2273_v8, 0.0  ;;  %v2274_v48 = vmul.f32 %v3794_v56, %v2252_v16  ;;  %v2232_v30 = vsub.f32 %v434_v23, %v2216_v61 }
 0x4d4   : > { %v3840_v52 = vsel %vm2279_vm2, %v2271_v24, 0.0  ;;  %v2272_v55 = vmul.f32 %v3794_v56, %v2250_v25  ;;  %v2247_v57 = vmul.f32 %v2231_v2, %v2231_v2  ;;  %v3899_v24 = vstv %s444_s14 }
 0x4d5   : > { %v2313_v7 = vsel %vm2279_vm2, %v2274_v48, 0.0  ;;  %v2248_v32 = vmul.f32 %v2232_v30, %v2232_v30 }
 0x4d6   : > { %2290 = vadd.xlane.f32.xlu1 %v2289_v58  ;;  %2284 = vadd.xlane.f32.xlu0 %v2283_v60  ;;  %v2307_v15 = vsel %vm2279_vm2, %v2272_v55, 0.0  ;;  %v2269_v47 = vmul.f32 %v3794_v56, %v2247_v57 }
 0x4d8   : > { %v2826_v22 = vpop.f32.mrb[92].mxu1  ;;  %v2298_v16 = vsel %vm2279_vm2, %v2269_v47, 0.0 }
 0x4d9   : > { %v2203_v29 = vadd.f32 %v2826_v22, %v3757_v43  ;;  %v2194_v31 = vpop.f32.mrb[93].mxu1 }
 0x4da   : > { %v2195_v46 = vadd.f32 %v3757_v43, %v2194_v31  ;;  %v2827_v53 = vpop.f32.mrb[94].mxu1 }
 0x4db   : > { %v2223_v1 = vmax.f32 %v2203_v29, 0.0  ;;  %v3852_v4 = vadd.f32 %v2827_v53, %v3757_v43  ;;  %v2197_v14 = vpop.f32.mrb[95].mxu1 }
 0x4dc   : > { %v2221_v42 = vmax.f32 %v2195_v46, 0.0  ;;  %v2198_v62 = vadd.f32 %v3757_v43, %v2197_v14 }
 0x4dd   : > { %v2239_v13 = vsub.f32 %v441_v34, %v2223_v1  ;;  %v2224_v11 = vmax.f32 %v3852_v4, 0.0 }
 0x4de   : > { %v2237_v6 = vsub.f32 %v439_v3, %v2221_v42  ;;  %v2222_v9 = vmax.f32 %v2198_v62, 0.0 }
 0x4df   : > { %v2240_v17 = vsub.f32 %v442_v49, %v2224_v11  ;;  %v2255_v19 = vmul.f32 %v2239_v13, %v2239_v13 }
 0x4e0   : > { %v2238_v28 = vsub.f32 %v440_v5, %v2222_v9  ;;  %v2253_v33 = vmul.f32 %v2237_v6, %v2237_v6 }
 0x4e1   : > { %v2256_v18 = vmul.f32 %v2240_v17, %v2240_v17  ;;  %v2277_v26 = vmul.f32 %v3794_v56, %v2255_v19 }
 0x4e2   : > { %v2275_v36 = vmul.f32 %v3794_v56, %v2253_v33  ;;  %v2254_v20 = vmul.f32 %v2238_v28, %v2238_v28 }
 0x4e3   : > { %v2278_v43 = vmul.f32 %v3794_v56, %v2256_v18  ;;  %v2322_v38 = vsel %vm2279_vm2, %v2277_v26, 0.0 }
 0x4e4   : > { %v2316_v40 = vsel %vm2279_vm2, %v2275_v36, 0.0  ;;  %v2276_v12 = vmul.f32 %v3794_v56, %v2254_v20 }
 0x4e5   : > { %v2325_v41 = vsel %vm2279_vm2, %v2278_v43, 0.0 }
 0x4e6   : > { %v2319_v45 = vsel %vm2279_vm2, %v2276_v12, 0.0 }
 0x4e7   : > { %2385 = vrot.lane.b32.xlu1 %v3778_v54, %s3017_s29  ;;  %v2270_v54 = vmul.f32 %v3794_v56, %v2248_v32 }
 0x4e9   : > { %v2301_v8 = vsel %vm2279_vm2, %v2270_v54, 0.0 }
 0x4eb   : > { %2391 = vrot.lane.b32.xlu1 %v3782_v21, %s3017_s29 }
 0x4ec   : > { %2389 = vrot.lane.b32.xlu0 %v3768_v59, %s3017_s29 }
 0x4f0   : > { %2387 = vrot.lane.b32.xlu0 %v3786_v27, %s3017_s29 }
 0x50f   : > { %2302 = vadd.xlane.f32.xlu1 %v2301_v8  ;;  %2299 = vadd.xlane.f32.xlu0 %v2298_v16 }
 0x513   : > { %2296 = vadd.xlane.f32.xlu1 %v3805_v39  ;;  %2293 = vadd.xlane.f32.xlu0 %v3800_v63 }
 0x51d   : > { %v2382_v59 = vpop.permute.xlu0 %2381 }
 0x520   : > { %v2380_v56 = vpop.permute.xlu1 %2379 }
 0x521   : > { %v2378_v21 = vpop.permute.xlu0 %2377 }
 0x524   : > { %2393 = vrot.lane.b32.xlu1 %v3812_v10, %s3017_s29 }
 0x525   : > { %v2384_v27 = vpop.permute.xlu0 %2383 }
 0x528   : > { %2399 = vrot.lane.b32.xlu1 %v3817_v37, %s3017_s29 }
 0x529   : > { %2397 = vrot.lane.b32.xlu0 %v3808_v50, %s3017_s29 }
 0x52c   : > { %2395 = vrot.lane.b32.xlu1 %v3822_v35, %s3017_s29 }
 0x548   : > { %2305 = vadd.xlane.f32.xlu0 %v3840_v52 }
 0x550   : > { %2311 = vadd.xlane.f32.xlu1 %v3836_v44 }
 0x554   : > { %2314 = vadd.xlane.f32.xlu1 %v2313_v7 }
 0x558   : > { %2308 = vadd.xlane.f32.xlu1 %v2307_v15 }
 0x55e   : > { %2405 = vrot.lane.b32.xlu0 %v2203_v29, %s3017_s29 }
 0x55f   : > { %v2282_v63 = vpop.xlane.xlu0 %2281  ;;  %v2288_v39 = vpop.xlane.xlu1 %2287 }
 0x560   : > { %v2328_v35 = vmul.f32 -0.5, %v2282_v63  ;;  %v2330_v60 = vmul.f32 -0.5, %v2288_v39 }
 0x562   : > { %2401 = vrot.lane.b32.xlu0 %v2195_v46, %s3017_s29  ;;  %v2345_v48 = vadd.f32 %v3899_v24, %v2328_v35  ;;  %v2347_v29 = vadd.f32 %v3899_v24, %v2330_v60 }
 0x563   : > { %v2285_v50 = vpop.xlane.xlu0 %2284  ;;  %v2291_v10 = vpop.xlane.xlu1 %2290 }
 0x564   : > { %v2329_v52 = vmul.f32 -0.5, %v2285_v50  ;;  %v2426_v15 = vsel %vm2425_vm3, %v2345_v48, %v2378_v21  ;;  %v2331_v31 = vmul.f32 -0.5, %v2291_v10  ;;  %v2428_v3 = vsel %vm2425_vm3, %v2347_v29, %v2382_v59 }
 0x566   : > { %v2346_v7 = vadd.f32 %v3899_v24, %v2329_v52  ;;  %v2348_v53 = vadd.f32 %v3899_v24, %v2331_v31 }
 0x567   : > { %v2390_v37 = vpop.permute.xlu0 %2389  ;;  %v2386_v25 = vpop.permute.xlu1 %2385 }
 0x568   : > { %v2427_v34 = vsel %vm2425_vm3, %v2346_v7, %v2380_v56  ;;  %v2429_v49 = vsel %vm2425_vm3, %v2348_v53, %v2384_v27 }
 0x569   : > { %2403 = vrot.lane.b32.xlu1 %v2198_v62, %s3017_s29 }
 0x56b   : > { %v2388_v44 = vpop.permute.xlu0 %2387  ;;  %v2392_v55 = vpop.permute.xlu1 %2391 }
 0x581   : > { %2317 = vadd.xlane.f32.xlu0 %v2316_v40 }
 0x585   : > { %2326 = vadd.xlane.f32.xlu0 %v2325_v41 }
 0x58d   : > { %2323 = vadd.xlane.f32.xlu1 %v2322_v38 }
 0x591   : > { %2320 = vadd.xlane.f32.xlu1 %v2319_v45 }
 0x59c   : > { %v2300_v58 = vpop.xlane.xlu0 %2299  ;;  %v2303_v22 = vpop.xlane.xlu1 %2302 }
 0x59d   : > { %v2334_v62 = vmul.f32 -0.5, %v2300_v58  ;;  %v2335_v5 = vmul.f32 -0.5, %v2303_v22 }
 0x59f   : > { %v2351_v6 = vadd.f32 %v3899_v24, %v2334_v62  ;;  %v2352_v17 = vadd.f32 %v3899_v24, %v2335_v5 }
 0x5a0   : > { %v2294_v46 = vpop.xlane.xlu0 %2293 }
 0x5a1   : > { %v2332_v1 = vmul.f32 -0.5, %v2294_v46  ;;  %v2432_v19 = vsel %vm2425_vm3, %v2351_v6, %v2390_v37  ;;  %v2433_v33 = vsel %vm2425_vm3, %v2352_v17, %v2392_v55 }
 0x5a2   : > { %2407 = vrot.lane.b32.xlu1 %v3852_v4, %s3017_s29  ;;  %v2297_v4 = vpop.xlane.xlu1 %2296 }
 0x5a3   : > { %v2333_v14 = vmul.f32 -0.5, %v2297_v4  ;;  %v2349_v42 = vadd.f32 %v3899_v24, %v2332_v1 }
 0x5a4   : > { %v2398_v18 = vpop.permute.xlu0 %2397 }
 0x5a5   : > { %v2350_v13 = vadd.f32 %v3899_v24, %v2333_v14  ;;  %v2430_v11 = vsel %vm2425_vm3, %v2349_v42, %v2386_v25 }
 0x5a6   : > { %v2394_v28 = vpop.permute.xlu1 %2393 }
 0x5a7   : > { %v2431_v9 = vsel %vm2425_vm3, %v2350_v13, %v2388_v44 }
 0x5aa   : > { %v2400_v26 = vpop.permute.xlu1 %2399 }
 0x5ae   : > { %v2396_v38 = vpop.permute.xlu1 %2395 }
 0x5b2   : > { %2442 = vxpose.xlu0.b32.start [1/16] (narrow) %v2426_v15, 8 }
 0x5b6   : > { %2443 = vxpose.xlu0.b32.cont [2/16] (narrow) %v2427_v34, 8 }
 0x5ba   : > { %2444 = vxpose.xlu0.b32.cont [3/16] (narrow) %v2428_v3, 8 }
 0x5be   : > { %2445 = vxpose.xlu0.b32.cont [4/16] (narrow) %v2429_v49, 8 }
 0x5c2   : > { %2446 = vxpose.xlu0.b32.cont [5/16] (narrow) %v2430_v11, 8 }
 0x5c6   : > { %2447 = vxpose.xlu0.b32.cont [6/16] (narrow) %v2431_v9, 8 }
 0x5ca   : > { %2448 = vxpose.xlu0.b32.cont [7/16] (narrow) %v2432_v19, 8 }
 0x5ce   : > { %2449 = vxpose.xlu0.b32.cont [8/16] (narrow) %v2433_v33, 8 }
 0x5d5   : > { %v2306_v36 = vpop.xlane.xlu0 %2305 }
 0x5d6   : > { %v2336_v20 = vmul.f32 -0.5, %v2306_v36 }
 0x5d8   : > { %v2353_v43 = vadd.f32 %v3899_v24, %v2336_v20 }
 0x5d9   : > { %v2406_v47 = vpop.permute.xlu0 %2405 }
 0x5da   : > { %v2434_v40 = vsel %vm2425_vm3, %v2353_v43, %v2394_v28 }
 0x5db   : > { %2450 = vxpose.xlu0.b32.cont [9/16] (narrow) %v2434_v40, 8 }
 0x5dd   : > { %v2312_v12 = vpop.xlane.xlu1 %2311  ;;  %v2402_v8 = vpop.permute.xlu0 %2401 }
 0x5de   : > { %v2338_v51 = vmul.f32 -0.5, %v2312_v12 }
 0x5e0   : > { %v2355_v23 = vadd.f32 %v3899_v24, %v2338_v51 }
 0x5e1   : > { %v2315_v41 = vpop.xlane.xlu1 %2314 }
 0x5e2   : > { %v2339_v2 = vmul.f32 -0.5, %v2315_v41  ;;  %v2436_v57 = vsel %vm2425_vm3, %v2355_v23, %v2398_v18 }
 0x5e4   : > { %v2356_v32 = vadd.f32 %v3899_v24, %v2339_v2 }
 0x5e5   : > { %v2309_v45 = vpop.xlane.xlu1 %2308 }
 0x5e6   : > { %v2337_v61 = vmul.f32 -0.5, %v2309_v45  ;;  %v2437_v54 = vsel %vm2425_vm3, %v2356_v32, %v2400_v26 }
 0x5e8   : > { %v2354_v0 = vadd.f32 %v3899_v24, %v2337_v61 }
 0x5e9   : > { %v2404_v56 = vpop.permute.xlu1 %2403 }
 0x5ea   : > { %v2435_v30 = vsel %vm2425_vm3, %v2354_v0, %v2396_v38 }
 0x5eb   : > { %2451 = vxpose.xlu0.b32.cont [10/16] (narrow) %v2435_v30, 8 }
 0x5ef   : > { %2452 = vxpose.xlu0.b32.cont [11/16] (narrow) %v2436_v57, 8 }
 0x5f3   : > { %2453 = vxpose.xlu0.b32.cont [12/16] (narrow) %v2437_v54, 8 }
 0x60e   : > { %v2318_v16 = vpop.xlane.xlu0 %2317 }
 0x60f   : > { %v2340_v59 = vmul.f32 -0.5, %v2318_v16 }
 0x611   : > { %v2357_v21 = vadd.f32 %v3899_v24, %v2340_v59 }
 0x612   : > { %v2327_v35 = vpop.xlane.xlu0 %2326 }
 0x613   : > { %v2438_v27 = vsel %vm2425_vm3, %v2357_v21, %v2402_v8  ;;  %v2343_v48 = vmul.f32 -0.5, %v2327_v35 }
 0x614   : > { %2454 = vxpose.xlu0.b32.cont [13/16] (narrow) %v2438_v27, 8 }
 0x615   : > { %v2360_v58 = vadd.f32 %v3899_v24, %v2343_v48 }
 0x61a   : > { %v2324_v63 = vpop.xlane.xlu1 %2323 }
 0x61b   : > { %v2342_v50 = vmul.f32 -0.5, %v2324_v63 }
 0x61d   : > { %v2359_v25 = vadd.f32 %v3899_v24, %v2342_v50 }
 0x61e   : > { %v2321_v39 = vpop.xlane.xlu1 %2320 }
 0x61f   : > { %v2341_v10 = vmul.f32 -0.5, %v2321_v39  ;;  %v2440_v52 = vsel %vm2425_vm3, %v2359_v25, %v2406_v47 }
 0x621   : > { %v2358_v37 = vadd.f32 %v3899_v24, %v2341_v10 }
 0x622   : > { %v2408_v55 = vpop.permute.xlu1 %2407 }
 0x623   : > { %v2439_v44 = vsel %vm2425_vm3, %v2358_v37, %v2404_v56  ;;  %v2441_v60 = vsel %vm2425_vm3, %v2360_v58, %v2408_v55 }
 0x624   : > { %2455 = vxpose.xlu0.b32.cont [14/16] (narrow) %v2439_v44, 8 }
 0x628   : > { %2456 = vxpose.xlu0.b32.cont [15/16] (narrow) %v2440_v52, 8 }
 0x62c   : > { %2457 = vxpose.xlu0.b32.end [16/16] (narrow) %v2441_v60, 8 }
 0x670   : > { %v2458_v7 = vpop.trf.xlu0 }
 0x671   : > { %2474 = vst [vmem:[%s409_s18] sm:$0x3] %v2458_v7 }
 0x672 PF: > { %s22_s19 = sadd.s32 1, %s3013_s19  }
 0x673   : > { %p19_p5 = scmp.ge.s32.totalorder %s22_s19, 4  }
 0x675   :  { %21 = sbr.rel (!%p19_p5) target bundleno = 2 (0x2), region = 97 }

</bundles_post_ra>
